<compile_context>
chip_gen: v7x
topology: tpu7x:2x2x1
jax: 0.10.0
libtpu: 0.0.40
codegen_flags: <defaults>
</compile_context>

<pallas_src>
import functools
import math

import jax
import jax.numpy as jnp
from jax import lax
from jax.experimental import pallas as pl
from jax.experimental.pallas import tpu as pltpu


def _mha_kernel(*refs, n_head, d_k, d_v, eps, mxu_dtype, fused_qkv, with_attn,
                flat, dense_out):
    """One grid step: a block of Bb batch elements, all heads, full fused fwd."""
    if fused_qkv:
        (q_ref, wqkv_ref, bqkv_ref, wo_ref, bo_ref, g_ref, be_ref) = refs[:7]
        rest = refs[7:]
    else:
        (q_ref, k_ref, v_ref, wq_ref, bq_ref, wk_ref, bk_ref,
         wv_ref, bv_ref, wo_ref, bo_ref, g_ref, be_ref) = refs[:13]
        rest = refs[13:]
    out_ref = rest[0]
    attn_ref = rest[1] if with_attn else None

    Bb, L, D = q_ref.shape
    rows = Bb * L
    H, dk, dv = n_head, d_k, d_v
    scale = 1.0 / math.sqrt(float(dk))

    def mm(a, b):
        if mxu_dtype is not None:
            a = a.astype(mxu_dtype)
            b = b.astype(mxu_dtype)
        return jnp.dot(a, b, preferred_element_type=jnp.float32)

    def bmm(eq, a, b):
        if mxu_dtype is not None:
            a = a.astype(mxu_dtype)
            b = b.astype(mxu_dtype)
        return jnp.einsum(eq, a, b, preferred_element_type=jnp.float32)

    q_in3 = q_ref[...].astype(jnp.float32)               # (Bb, L, D)

    def proj3(x3, w, b):
        # Fallback for L % 8 != 0: batched matmul, no row-flattening reshape.
        wb = jnp.broadcast_to(w, (Bb,) + w.shape)
        return bmm('bld,bdf->blf', x3, wb) + b.reshape(1, 1, -1)

    if flat:
        q_in = q_in3.reshape(rows, D)                    # layout no-op (L % 8 == 0)
        if fused_qkv:
            qkv = mm(q_in, wqkv_ref[...]) + bqkv_ref[...]     # (rows, 2*H*dk+H*dv)
            qp = qkv[:, :H * dk]
            kp = qkv[:, H * dk:2 * H * dk]
            vp = qkv[:, 2 * H * dk:]
        else:
            qp = mm(q_in, wq_ref[...]) + bq_ref[...]
            kp = mm(k_ref[...].astype(jnp.float32).reshape(rows, D),
                    wk_ref[...]) + bk_ref[...]
            vp = mm(v_ref[...].astype(jnp.float32).reshape(rows, D),
                    wv_ref[...]) + bv_ref[...]

        def head(x, h, dh):
            return x[:, h * dh:(h + 1) * dh].reshape(Bb, L, dh)
    else:
        if fused_qkv:
            qkv = proj3(q_in3, wqkv_ref[...], bqkv_ref[...])
            qp = qkv[..., :H * dk]
            kp = qkv[..., H * dk:2 * H * dk]
            vp = qkv[..., 2 * H * dk:]
        else:
            qp = proj3(q_in3, wq_ref[...], bq_ref[...])
            kp = proj3(k_ref[...].astype(jnp.float32), wk_ref[...], bk_ref[...])
            vp = proj3(v_ref[...].astype(jnp.float32), wv_ref[...], bv_ref[...])

        def head(x, h, dh):
            return x[..., h * dh:(h + 1) * dh]

    ctx_heads = []
    for h in range(H):                                   # small & static -> unrolled
        qh = head(qp, h, dk)                             # (Bb, L, dk)
        kh = head(kp, h, dk)
        vh = head(vp, h, dv)

        # Batched scores, contracting last dims (no explicit transpose of K).
        s = bmm('bqd,bkd->bqk', qh, kh) * scale          # (Bb, L, L) f32
        s = s - jnp.max(s, axis=-1, keepdims=True)
        e = jnp.exp(s)
        den = jnp.sum(e, axis=-1, keepdims=True)
        if mxu_dtype is None:
            attn = e / den                               # exact softmax
        else:
            attn = e * pl.reciprocal(den, approx=True)   # EUP reciprocal

        if attn_ref is not None:
            a_st = attn.astype(attn_ref.dtype)
            if dense_out:
                attn_ref[:, h] = a_st.reshape(Bb, L * L)
            else:
                attn_ref[:, h] = a_st

        ctx_heads.append(bmm('bqk,bkd->bqd', attn, vh))  # (Bb, L, dv)

    ctx = ctx_heads[0] if H == 1 else jnp.concatenate(ctx_heads, axis=-1)

    # Single output-projection matmul over head-concatenated features, then
    # bias, residual (on q) and LayerNorm over the feature axis.
    if flat:
        x = mm(ctx.reshape(rows, H * dv), wo_ref[...]) + bo_ref[...] + q_in
        gamma, beta = g_ref[...], be_ref[...]            # (1, D)
    else:
        x = proj3(ctx, wo_ref[...], bo_ref[...]) + q_in3
        gamma = g_ref[...].reshape(1, 1, -1)
        beta = be_ref[...].reshape(1, 1, -1)

    mu = jnp.mean(x, axis=-1, keepdims=True)
    d = x - mu
    var = jnp.mean(d * d, axis=-1, keepdims=True)
    y = d * lax.rsqrt(var + eps) * gamma + beta

    if flat and dense_out:
        out_ref[...] = y.reshape(Bb, 1, L * D).astype(out_ref.dtype)
    elif flat:
        out_ref[...] = y.reshape(Bb, L, D).astype(out_ref.dtype)
    else:
        out_ref[...] = y.astype(out_ref.dtype)


def _tpu_vmem_and_cores():
    """Best-effort query of per-core VMEM capacity and TensorCores per chip."""
    vmem = 128 * 1024 * 1024
    cores = 1
    try:
        info = pltpu.get_tpu_info()
        vmem = int(getattr(info, "vmem_capacity_bytes", vmem)) or vmem
    except Exception:
        pass
    try:
        kind = jax.devices()[0].device_kind.lower()
        if "v7" in kind:             # 2 TensorCores / chip, 64 MiB VMEM each
            cores = 2
    except Exception:
        pass
    return vmem, cores


def _estimate_step_bytes(bb, L, D, H, d_k, d_v, with_attn, fused):
    """Honest per-grid-step VMEM estimate: double-buffered blocks, resident
    weights and in-kernel intermediates (qp/kp/vp, score/exp, ctx, LN temps)."""
    f32 = 4
    rows = bb * L
    n_in = 1 if fused else 3
    io = (n_in + 1) * bb * L * D * f32                   # q[,k,v] blocks + y block
    if with_attn:
        io += H * bb * L * L * f32
    io *= 2                                              # double-buffered pipeline
    w = (2 * D * H * d_k + 2 * D * H * d_v               # w_qs+w_ks, w_vs+fc
         + 2 * H * d_k + H * d_v + 3 * D) * f32
    w *= 2
    inter = rows * (2 * H * d_k + H * d_v) * f32         # qp, kp, vp
    inter += 3 * bb * L * L * f32                        # s / exp / attn (live head)
    inter += rows * (H * d_v + 2 * D) * f32              # ctx, x, y
    return io + w + inter


def _choose_batch_block(B, L, D, H, d_k, d_v, *, with_attn, fused,
                        vmem_budget, num_cores):
    divisors = [d for d in range(1, B + 1) if B % d == 0]
    fitting = [d for d in divisors
               if _estimate_step_bytes(d, L, D, H, d_k, d_v, with_attn, fused)
               <= vmem_budget] or [1]
    if num_cores >= 2:
        # Keep >= 2 grid steps per TensorCore so megacore sharding has work.
        multi = [d for d in fitting if B // d >= 2 * num_cores]
        if multi:
            fitting = multi
    # Largest fitting block: biggest flattened matmul M, fewest per-step overheads.
    return max(fitting)


def multi_head_attention(q, k, v, params, *, n_head, d_k, d_v, eps=1e-5,
                         return_attn=True, mxu_dtype=jnp.bfloat16,
                         attn_dtype=jnp.float32, batch_block=None):
    """q, k, v: (B, L, d_model).

    Returns (output (B, L, d_model), attn (n_head*B, L, L)) when return_attn,
    else just the output.  Default mxu_dtype=bf16 feeds the MXU bf16 operands
    with f32 accumulation (softmax / LayerNorm stay f32); mxu_dtype=None gives
    exact f32 matmuls and an exact softmax.
    """
    B, L, D = q.shape
    assert k.shape == (B, L, D) and v.shape == (B, L, D)
    H = n_head

    wq, bq = params["w_qs"]
    wk, bk = params["w_ks"]
    wv, bv = params["w_vs"]
    wo, bo = params["fc"]
    gamma, beta = params["layer_norm"]

    # Host-side weight prep: pre-transpose to (in, out); fuse QKV for self-attn.
    wq_t, wk_t, wv_t = wq.T, wk.T, wv.T                  # (D, H*dk) / (D, H*dv)
    wo_t = wo.T                                          # (H*dv, D)
    bq2, bk2, bv2, bo2 = (x.reshape(1, -1) for x in (bq, bk, bv, bo))
    g2, be2 = gamma.reshape(1, -1), beta.reshape(1, -1)

    fused = (q is k) and (q is v)                        # self-attention fast path
    if fused:
        w_qkv = jnp.concatenate([wq_t, wk_t, wv_t], axis=1)   # (D, 2*H*dk+H*dv)
        b_qkv = jnp.concatenate([bq2, bk2, bv2], axis=1)

    flat = (L % 8 == 0)        # (Bb,L,D)->(Bb*L,D) reshapes are layout no-ops

    vmem_cap, n_cores = _tpu_vmem_and_cores()
    step_budget = max(4 << 20, min(vmem_cap // 3, 48 << 20))
    vmem_limit = int(min(vmem_cap * 3 // 4, 100 << 20))
    Bb = batch_block if batch_block is not None else _choose_batch_block(
        B, L, D, H, d_k, d_v, with_attn=return_attn, fused=fused,
        vmem_budget=step_budget, num_cores=n_cores)
    assert B % Bb == 0, "batch_block must divide B"
    grid = (B // Bb,)

    def full_spec(arr):
        # TODO(synk): pipeline_mode=pl.Buffered(1) would halve resident-weight
        # VMEM (weights never change across grid steps).
        return pl.BlockSpec(arr.shape, lambda b, n=arr.ndim: (0,) * n)

    blk_spec = pl.BlockSpec((Bb, L, D), lambda b: (b, 0, 0))

    def run(dense_out):
        kernel = functools.partial(
            _mha_kernel, n_head=H, d_k=d_k, d_v=d_v, eps=eps,
            mxu_dtype=mxu_dtype, fused_qkv=fused, with_attn=return_attn,
            flat=flat, dense_out=dense_out)

        if fused:
            args = (q, w_qkv, b_qkv, wo_t, bo2, g2, be2)
            in_specs = [blk_spec] + [full_spec(a) for a in args[1:]]
        else:
            args = (q, k, v, wq_t, bq2, wk_t, bk2, wv_t, bv2, wo_t, bo2, g2, be2)
            in_specs = [blk_spec] * 3 + [full_spec(a) for a in args[3:]]

        if dense_out:
            # Lane-dense output layouts (unmasked stores); reshaped back on host.
            y_shape = jax.ShapeDtypeStruct((B, 1, L * D), q.dtype)
            y_spec = pl.BlockSpec((Bb, 1, L * D), lambda b: (b, 0, 0))
            a_shape = jax.ShapeDtypeStruct((B, H, L * L), attn_dtype)
            a_spec = pl.BlockSpec((Bb, H, L * L), lambda b: (b, 0, 0))
        else:
            y_shape = jax.ShapeDtypeStruct((B, L, D), q.dtype)
            y_spec = pl.BlockSpec((Bb, L, D), lambda b: (b, 0, 0))
            a_shape = jax.ShapeDtypeStruct((B, H, L, L), attn_dtype)
            a_spec = pl.BlockSpec((Bb, H, L, L), lambda b: (b, 0, 0, 0))

        out_shape = (y_shape, a_shape) if return_attn else y_shape
        out_specs = [y_spec, a_spec] if return_attn else y_spec

        return pl.pallas_call(
            kernel,
            out_shape=out_shape,
            grid_spec=pltpu.PrefetchScalarGridSpec(
                num_scalar_prefetch=0,
                grid=grid,
                in_specs=in_specs,
                out_specs=out_specs,
            ),
            compiler_params=pltpu.CompilerParams(
                dimension_semantics=("parallel",),
                vmem_limit_bytes=vmem_limit,
            ),
        )(*args)

    dense = flat
    if dense:
        try:
            result = run(dense_out=True)
        except Exception:
            # Some toolchains reject the lane-merging reshapes; fall back to the
            # torch-shaped (masked-store) output layout.
            dense = False
            result = run(dense_out=False)
    else:
        result = run(dense_out=False)

    if return_attn:
        out, attn = result
    else:
        out, attn = result, None

    if dense:
        out = out.reshape(B, L, D)
        if attn is not None:
            attn = attn.reshape(B, H, L, L)
    if attn is not None:
        # Torch ordering: attn index = h * B + b.
        attn = jnp.transpose(attn, (1, 0, 2, 3)).reshape(H * B, L, L)
        return out, attn
    return out


def reference_mha(q, k, v, params, *, n_head, d_k, d_v, eps=1e-5):
    """Pure-JAX reference mirroring the PyTorch module (eval mode)."""
    wq, bq = params["w_qs"]
    wk, bk = params["w_ks"]
    wv, bv = params["w_vs"]
    wo, bo = params["fc"]
    gamma, beta = params["layer_norm"]
    B, L, D = q.shape
    hp = jax.lax.Precision.HIGHEST

    qp = jnp.einsum('bld,ed->ble', q, wq, precision=hp) + bq
    kp = jnp.einsum('bld,ed->ble', k, wk, precision=hp) + bk
    vp = jnp.einsum('bld,ed->ble', v, wv, precision=hp) + bv

    def split(x, dh):
        return x.reshape(B, L, n_head, dh).transpose(2, 0, 1, 3).reshape(n_head * B, L, dh)

    qh, kh, vh = split(qp, d_k), split(kp, d_k), split(vp, d_v)
    s = jnp.einsum('nqd,nkd->nqk', qh, kh, precision=hp) / math.sqrt(d_k)
    attn = jax.nn.softmax(s, axis=-1)
    o = jnp.einsum('nqk,nkd->nqd', attn, vh, precision=hp)
    o = o.reshape(n_head, B, L, d_v).transpose(1, 2, 0, 3).reshape(B, L, n_head * d_v)
    o = jnp.einsum('blf,df->bld', o, wo, precision=hp) + bo
    x = o + q
    mu = x.mean(-1, keepdims=True)
    var = ((x - mu) ** 2).mean(-1, keepdims=True)
    y = (x - mu) / jnp.sqrt(var + eps) * gamma + beta
    return y, attn


def init_params(key, n_head, d_model, d_k, d_v):
    ks = jax.random.split(key, 8)
    std_qk = math.sqrt(2.0 / (d_model + d_k))
    std_v = math.sqrt(2.0 / (d_model + d_v))
    # Linear weights: (out_features, in_features), PyTorch convention.
    w_qs = jax.random.normal(ks[0], (n_head * d_k, d_model), jnp.float32) * std_qk
    w_ks = jax.random.normal(ks[1], (n_head * d_k, d_model), jnp.float32) * std_qk
    w_vs = jax.random.normal(ks[2], (n_head * d_v, d_model), jnp.float32) * std_v
    std_fc = math.sqrt(2.0 / (n_head * d_v + d_model))   # xavier_normal
    w_fc = jax.random.normal(ks[3], (d_model, n_head * d_v), jnp.float32) * std_fc
    b_qs = jax.random.uniform(ks[4], (n_head * d_k,), jnp.float32,
                              -1.0 / math.sqrt(d_model), 1.0 / math.sqrt(d_model))
    b_ks = jax.random.uniform(ks[5], (n_head * d_k,), jnp.float32,
                              -1.0 / math.sqrt(d_model), 1.0 / math.sqrt(d_model))
    b_vs = jax.random.uniform(ks[6], (n_head * d_v,), jnp.float32,
                              -1.0 / math.sqrt(d_model), 1.0 / math.sqrt(d_model))
    b_fc = jax.random.uniform(ks[7], (d_model,), jnp.float32,
                              -1.0 / math.sqrt(n_head * d_v), 1.0 / math.sqrt(n_head * d_v))
    gamma = jnp.ones((d_model,), jnp.float32)
    beta = jnp.zeros((d_model,), jnp.float32)
    return {
        "w_qs": (w_qs, b_qs),
        "w_ks": (w_ks, b_ks),
        "w_vs": (w_vs, b_vs),
        "fc": (w_fc, b_fc),
        "layer_norm": (gamma, beta),
    }


if __name__ == "__main__":
    # Small shapes consistent with the module.
    B, L, d_model = 2, 8, 32
    n_head, d_k, d_v = 2, 16, 16

    key = jax.random.PRNGKey(0)
    k_params, k_q, k_k, k_v = jax.random.split(key, 4)

    params = init_params(k_params, n_head, d_model, d_k, d_v)
    q = jax.random.normal(k_q, (B, L, d_model), jnp.float32)
    k = jax.random.normal(k_k, (B, L, d_model), jnp.float32)
    v = jax.random.normal(k_v, (B, L, d_model), jnp.float32)

    ref_out, ref_attn = reference_mha(q, k, v, params,
                                      n_head=n_head, d_k=d_k, d_v=d_v)

    # Default path: bf16 MXU operands, f32 accumulation / softmax / LayerNorm.
    out, attn = multi_head_attention(q, k, v, params,
                                     n_head=n_head, d_k=d_k, d_v=d_v)
    jax.block_until_ready(out)
    jax.block_until_ready(attn)
    assert out.shape == (B, L, d_model)
    assert attn.shape == (n_head * B, L, L)
    assert jnp.allclose(out, ref_out, atol=5e-2, rtol=5e-2)
    assert jnp.allclose(attn, ref_attn, atol=5e-2, rtol=5e-2)

    # Exact path: f32 MXU operands + exact softmax divide (tight tolerance).
    out_x, attn_x = multi_head_attention(q, k, v, params, n_head=n_head,
                                         d_k=d_k, d_v=d_v, mxu_dtype=None)
    jax.block_until_ready(out_x)
    assert jnp.allclose(out_x, ref_out, atol=2e-3, rtol=2e-3)
    assert jnp.allclose(attn_x, ref_attn, atol=2e-3, rtol=2e-3)

    # Self-attention fast path (fused QKV projection).
    ref_s_out, ref_s_attn = reference_mha(q, q, q, params,
                                          n_head=n_head, d_k=d_k, d_v=d_v)
    out_s, attn_s = multi_head_attention(q, q, q, params,
                                         n_head=n_head, d_k=d_k, d_v=d_v)
    jax.block_until_ready(out_s)
    assert jnp.allclose(out_s, ref_s_out, atol=5e-2, rtol=5e-2)
    assert jnp.allclose(attn_s, ref_s_attn, atol=5e-2, rtol=5e-2)

    # Production path: skip the attn writeback entirely.
    out2 = multi_head_attention(q, k, v, params, n_head=n_head, d_k=d_k, d_v=d_v,
                                return_attn=False)
    jax.block_until_ready(out2)
    assert jnp.allclose(out2, ref_out, atol=5e-2, rtol=5e-2)

    print("KERNEL_OK")
</pallas_src>

<mosaic_0001>
module attributes {stable_mosaic.version = 11 : i64} {
  func.func @_mha_kernel(%arg0: i32, %arg1: memref<2x8x32xf32, #tpu.memory_space<vmem>>, %arg2: memref<2x8x32xf32, #tpu.memory_space<vmem>>, %arg3: memref<2x8x32xf32, #tpu.memory_space<vmem>>, %arg4: memref<32x32xf32, #tpu.memory_space<vmem>>, %arg5: memref<1x32xf32, #tpu.memory_space<vmem>>, %arg6: memref<32x32xf32, #tpu.memory_space<vmem>>, %arg7: memref<1x32xf32, #tpu.memory_space<vmem>>, %arg8: memref<32x32xf32, #tpu.memory_space<vmem>>, %arg9: memref<1x32xf32, #tpu.memory_space<vmem>>, %arg10: memref<32x32xf32, #tpu.memory_space<vmem>>, %arg11: memref<1x32xf32, #tpu.memory_space<vmem>>, %arg12: memref<1x32xf32, #tpu.memory_space<vmem>>, %arg13: memref<1x32xf32, #tpu.memory_space<vmem>>, %arg14: memref<2x1x256xf32, #tpu.memory_space<vmem>>, %arg15: memref<2x2x64xf32, #tpu.memory_space<vmem>>) attributes {dimension_semantics = [#tpu.dimension_semantics<parallel>], iteration_bounds = array<i64: 1>, scalar_prefetch = 0 : i64, scratch_operands = 0 : i64, tpu.core_type = #tpu.core_type<tc>, window_params = [{transform_indices = @transform_0, window_bounds = array<i64: 2, 8, 32>}, {transform_indices = @transform_1, window_bounds = array<i64: 2, 8, 32>}, {transform_indices = @transform_2, window_bounds = array<i64: 2, 8, 32>}, {pipeline_mode = #tpu.pipeline_mode<synchronous>, transform_indices = @transform_3, window_bounds = array<i64: 32, 32>}, {pipeline_mode = #tpu.pipeline_mode<synchronous>, transform_indices = @transform_4, window_bounds = array<i64: 1, 32>}, {pipeline_mode = #tpu.pipeline_mode<synchronous>, transform_indices = @transform_5, window_bounds = array<i64: 32, 32>}, {pipeline_mode = #tpu.pipeline_mode<synchronous>, transform_indices = @transform_6, window_bounds = array<i64: 1, 32>}, {pipeline_mode = #tpu.pipeline_mode<synchronous>, transform_indices = @transform_7, window_bounds = array<i64: 32, 32>}, {pipeline_mode = #tpu.pipeline_mode<synchronous>, transform_indices = @transform_8, window_bounds = array<i64: 1, 32>}, {pipeline_mode = #tpu.pipeline_mode<synchronous>, transform_indices = @transform_9, window_bounds = array<i64: 32, 32>}, {pipeline_mode = #tpu.pipeline_mode<synchronous>, transform_indices = @transform_10, window_bounds = array<i64: 1, 32>}, {pipeline_mode = #tpu.pipeline_mode<synchronous>, transform_indices = @transform_11, window_bounds = array<i64: 1, 32>}, {pipeline_mode = #tpu.pipeline_mode<synchronous>, transform_indices = @transform_12, window_bounds = array<i64: 1, 32>}, {transform_indices = @transform_13, window_bounds = array<i64: 2, 1, 256>}, {transform_indices = @transform_14, window_bounds = array<i64: 2, 2, 64>}]} {
    %c0 = arith.constant 0 : index
    %c0_0 = arith.constant 0 : index
    %c0_1 = arith.constant 0 : index
    %0 = vector.load %arg1[%c0, %c0_0, %c0_1] : memref<2x8x32xf32, #tpu.memory_space<vmem>>, vector<2x8x32xf32>
    %1 = vector.shape_cast %0 : vector<2x8x32xf32> to vector<16x32xf32>
    %c0_2 = arith.constant 0 : index
    %c0_3 = arith.constant 0 : index
    %2 = vector.load %arg4[%c0_2, %c0_3] : memref<32x32xf32, #tpu.memory_space<vmem>>, vector<32x32xf32>
    %3 = arith.truncf %1 : vector<16x32xf32> to vector<16x32xbf16>
    %4 = arith.truncf %2 : vector<32x32xf32> to vector<32x32xbf16>
    %cst = arith.constant dense<0.000000e+00> : vector<16x32xf32>
    %5 = tpu.matmul %3, %4, %cst {dimension_numbers = #tpu.dot_dimension_numbers<[1], [0], [0], [1], [0, 0, 1, 1], [], []>} : vector<16x32xbf16>, vector<32x32xbf16>, vector<16x32xf32> -> vector<16x32xf32>
    %c0_4 = arith.constant 0 : index
    %c0_5 = arith.constant 0 : index
    %6 = vector.load %arg5[%c0_4, %c0_5] : memref<1x32xf32, #tpu.memory_space<vmem>>, vector<1x32xf32>
    %7 = vector.broadcast %6 : vector<1x32xf32> to vector<16x32xf32>
    %8 = arith.addf %5, %7 : vector<16x32xf32>
    %c0_6 = arith.constant 0 : index
    %c0_7 = arith.constant 0 : index
    %c0_8 = arith.constant 0 : index
    %9 = vector.load %arg2[%c0_6, %c0_7, %c0_8] : memref<2x8x32xf32, #tpu.memory_space<vmem>>, vector<2x8x32xf32>
    %10 = vector.shape_cast %9 : vector<2x8x32xf32> to vector<16x32xf32>
    %c0_9 = arith.constant 0 : index
    %c0_10 = arith.constant 0 : index
    %11 = vector.load %arg6[%c0_9, %c0_10] : memref<32x32xf32, #tpu.memory_space<vmem>>, vector<32x32xf32>
    %12 = arith.truncf %10 : vector<16x32xf32> to vector<16x32xbf16>
    %13 = arith.truncf %11 : vector<32x32xf32> to vector<32x32xbf16>
    %cst_11 = arith.constant dense<0.000000e+00> : vector<16x32xf32>
    %14 = tpu.matmul %12, %13, %cst_11 {dimension_numbers = #tpu.dot_dimension_numbers<[1], [0], [0], [1], [0, 0, 1, 1], [], []>} : vector<16x32xbf16>, vector<32x32xbf16>, vector<16x32xf32> -> vector<16x32xf32>
    %c0_12 = arith.constant 0 : index
    %c0_13 = arith.constant 0 : index
    %15 = vector.load %arg7[%c0_12, %c0_13] : memref<1x32xf32, #tpu.memory_space<vmem>>, vector<1x32xf32>
    %16 = vector.broadcast %15 : vector<1x32xf32> to vector<16x32xf32>
    %17 = arith.addf %14, %16 : vector<16x32xf32>
    %c0_14 = arith.constant 0 : index
    %c0_15 = arith.constant 0 : index
    %c0_16 = arith.constant 0 : index
    %18 = vector.load %arg3[%c0_14, %c0_15, %c0_16] : memref<2x8x32xf32, #tpu.memory_space<vmem>>, vector<2x8x32xf32>
    %19 = vector.shape_cast %18 : vector<2x8x32xf32> to vector<16x32xf32>
    %c0_17 = arith.constant 0 : index
    %c0_18 = arith.constant 0 : index
    %20 = vector.load %arg8[%c0_17, %c0_18] : memref<32x32xf32, #tpu.memory_space<vmem>>, vector<32x32xf32>
    %21 = arith.truncf %19 : vector<16x32xf32> to vector<16x32xbf16>
    %22 = arith.truncf %20 : vector<32x32xf32> to vector<32x32xbf16>
    %cst_19 = arith.constant dense<0.000000e+00> : vector<16x32xf32>
    %23 = tpu.matmul %21, %22, %cst_19 {dimension_numbers = #tpu.dot_dimension_numbers<[1], [0], [0], [1], [0, 0, 1, 1], [], []>} : vector<16x32xbf16>, vector<32x32xbf16>, vector<16x32xf32> -> vector<16x32xf32>
    %c0_20 = arith.constant 0 : index
    %c0_21 = arith.constant 0 : index
    %24 = vector.load %arg9[%c0_20, %c0_21] : memref<1x32xf32, #tpu.memory_space<vmem>>, vector<1x32xf32>
    %25 = vector.broadcast %24 : vector<1x32xf32> to vector<16x32xf32>
    %26 = arith.addf %23, %25 : vector<16x32xf32>
    %27 = vector.extract_strided_slice %8 {offsets = [0, 0], sizes = [16, 16], strides = [1, 1]} : vector<16x32xf32> to vector<16x16xf32>
    %28 = vector.shape_cast %27 : vector<16x16xf32> to vector<2x8x16xf32>
    %29 = vector.extract_strided_slice %17 {offsets = [0, 0], sizes = [16, 16], strides = [1, 1]} : vector<16x32xf32> to vector<16x16xf32>
    %30 = vector.shape_cast %29 : vector<16x16xf32> to vector<2x8x16xf32>
    %31 = vector.extract_strided_slice %26 {offsets = [0, 0], sizes = [16, 16], strides = [1, 1]} : vector<16x32xf32> to vector<16x16xf32>
    %32 = vector.shape_cast %31 : vector<16x16xf32> to vector<2x8x16xf32>
    %33 = arith.truncf %28 : vector<2x8x16xf32> to vector<2x8x16xbf16>
    %34 = arith.truncf %30 : vector<2x8x16xf32> to vector<2x8x16xbf16>
    "tpu.trace_start"() <{level = 10 : i32, message = "bqd,bkd->bqk"}> : () -> ()
    %cst_22 = arith.constant dense<0.000000e+00> : vector<2x8x8xf32>
    %35 = tpu.matmul %33, %34, %cst_22 {dimension_numbers = #tpu.dot_dimension_numbers<[2], [2], [1], [1], [0, 0, 0, 1, 1, 1], [0], [0]>} : vector<2x8x16xbf16>, vector<2x8x16xbf16>, vector<2x8x8xf32> -> vector<2x8x8xf32>
    "tpu.trace_stop"() : () -> ()
    %cst_23 = arith.constant 2.500000e-01 : f32
    %36 = vector.broadcast %cst_23 : f32 to vector<2x8x8xf32>
    %37 = arith.mulf %35, %36 : vector<2x8x8xf32>
    %cst_24 = arith.constant dense<0xFF800000> : vector<2x8xf32>
    %38 = vector.multi_reduction <maximumf>, %37, %cst_24 [2] : vector<2x8x8xf32> to vector<2x8xf32>
    %39 = vector.shape_cast %38 : vector<2x8xf32> to vector<2x8x1xf32>
    %40 = vector.broadcast %39 : vector<2x8x1xf32> to vector<2x8x8xf32>
    %41 = arith.subf %37, %40 : vector<2x8x8xf32>
    %42 = math.exp %41 : vector<2x8x8xf32>
    %cst_25 = arith.constant dense<0.000000e+00> : vector<2x8xf32>
    %43 = vector.multi_reduction <add>, %42, %cst_25 [2] : vector<2x8x8xf32> to vector<2x8xf32>
    %44 = vector.shape_cast %43 : vector<2x8xf32> to vector<2x8x1xf32>
    %45 = tpu.reciprocal %44 {approx = true} : vector<2x8x1xf32> -> vector<2x8x1xf32>
    %46 = vector.broadcast %45 : vector<2x8x1xf32> to vector<2x8x8xf32>
    %47 = arith.mulf %42, %46 : vector<2x8x8xf32>
    %48 = vector.shape_cast %47 : vector<2x8x8xf32> to vector<2x64xf32>
    %c0_26 = arith.constant 0 : index
    %c0_27 = arith.constant 0 : index
    %c0_28 = arith.constant 0 : index
    %49 = vector.load %arg15[%c0_26, %c0_27, %c0_28] : memref<2x2x64xf32, #tpu.memory_space<vmem>>, vector<2x1x64xf32>
    %50 = vector.shape_cast %49 : vector<2x1x64xf32> to vector<2x64xf32>
    %51 = vector.shape_cast %48 : vector<2x64xf32> to vector<2x1x64xf32>
    tpu.vector_store %arg15[%c0_26, %c0_27, %c0_28], %51 {strides = array<i32>} : memref<2x2x64xf32, #tpu.memory_space<vmem>>, vector<2x1x64xf32>,
    %52 = arith.truncf %47 : vector<2x8x8xf32> to vector<2x8x8xbf16>
    %53 = arith.truncf %32 : vector<2x8x16xf32> to vector<2x8x16xbf16>
    "tpu.trace_start"() <{level = 10 : i32, message = "bqk,bkd->bqd"}> : () -> ()
    %cst_29 = arith.constant dense<0.000000e+00> : vector<2x8x16xf32>
    %54 = tpu.matmul %52, %53, %cst_29 {dimension_numbers = #tpu.dot_dimension_numbers<[2], [1], [1], [2], [0, 0, 0, 1, 1, 2], [0], [0]>} : vector<2x8x8xbf16>, vector<2x8x16xbf16>, vector<2x8x16xf32> -> vector<2x8x16xf32>
    "tpu.trace_stop"() : () -> ()
    %55 = vector.extract_strided_slice %8 {offsets = [0, 16], sizes = [16, 16], strides = [1, 1]} : vector<16x32xf32> to vector<16x16xf32>
    %56 = vector.shape_cast %55 : vector<16x16xf32> to vector<2x8x16xf32>
    %57 = vector.extract_strided_slice %17 {offsets = [0, 16], sizes = [16, 16], strides = [1, 1]} : vector<16x32xf32> to vector<16x16xf32>
    %58 = vector.shape_cast %57 : vector<16x16xf32> to vector<2x8x16xf32>
    %59 = vector.extract_strided_slice %26 {offsets = [0, 16], sizes = [16, 16], strides = [1, 1]} : vector<16x32xf32> to vector<16x16xf32>
    %60 = vector.shape_cast %59 : vector<16x16xf32> to vector<2x8x16xf32>
    %61 = arith.truncf %56 : vector<2x8x16xf32> to vector<2x8x16xbf16>
    %62 = arith.truncf %58 : vector<2x8x16xf32> to vector<2x8x16xbf16>
    "tpu.trace_start"() <{level = 10 : i32, message = "bqd,bkd->bqk"}> : () -> ()
    %cst_30 = arith.constant dense<0.000000e+00> : vector<2x8x8xf32>
    %63 = tpu.matmul %61, %62, %cst_30 {dimension_numbers = #tpu.dot_dimension_numbers<[2], [2], [1], [1], [0, 0, 0, 1, 1, 1], [0], [0]>} : vector<2x8x16xbf16>, vector<2x8x16xbf16>, vector<2x8x8xf32> -> vector<2x8x8xf32>
    "tpu.trace_stop"() : () -> ()
    %cst_31 = arith.constant 2.500000e-01 : f32
    %64 = vector.broadcast %cst_31 : f32 to vector<2x8x8xf32>
    %65 = arith.mulf %63, %64 : vector<2x8x8xf32>
    %cst_32 = arith.constant dense<0xFF800000> : vector<2x8xf32>
    %66 = vector.multi_reduction <maximumf>, %65, %cst_32 [2] : vector<2x8x8xf32> to vector<2x8xf32>
    %67 = vector.shape_cast %66 : vector<2x8xf32> to vector<2x8x1xf32>
    %68 = vector.broadcast %67 : vector<2x8x1xf32> to vector<2x8x8xf32>
    %69 = arith.subf %65, %68 : vector<2x8x8xf32>
    %70 = math.exp %69 : vector<2x8x8xf32>
    %cst_33 = arith.constant dense<0.000000e+00> : vector<2x8xf32>
    %71 = vector.multi_reduction <add>, %70, %cst_33 [2] : vector<2x8x8xf32> to vector<2x8xf32>
    %72 = vector.shape_cast %71 : vector<2x8xf32> to vector<2x8x1xf32>
    %73 = tpu.reciprocal %72 {approx = true} : vector<2x8x1xf32> -> vector<2x8x1xf32>
    %74 = vector.broadcast %73 : vector<2x8x1xf32> to vector<2x8x8xf32>
    %75 = arith.mulf %70, %74 : vector<2x8x8xf32>
    %76 = vector.shape_cast %75 : vector<2x8x8xf32> to vector<2x64xf32>
    %c0_34 = arith.constant 0 : index
    %c1 = arith.constant 1 : index
    %c0_35 = arith.constant 0 : index
    %77 = vector.load %arg15[%c0_34, %c1, %c0_35] : memref<2x2x64xf32, #tpu.memory_space<vmem>>, vector<2x1x64xf32>
    %78 = vector.shape_cast %77 : vector<2x1x64xf32> to vector<2x64xf32>
    %79 = vector.shape_cast %76 : vector<2x64xf32> to vector<2x1x64xf32>
    tpu.vector_store %arg15[%c0_34, %c1, %c0_35], %79 {strides = array<i32>} : memref<2x2x64xf32, #tpu.memory_space<vmem>>, vector<2x1x64xf32>,
    %80 = arith.truncf %75 : vector<2x8x8xf32> to vector<2x8x8xbf16>
    %81 = arith.truncf %60 : vector<2x8x16xf32> to vector<2x8x16xbf16>
    "tpu.trace_start"() <{level = 10 : i32, message = "bqk,bkd->bqd"}> : () -> ()
    %cst_36 = arith.constant dense<0.000000e+00> : vector<2x8x16xf32>
    %82 = tpu.matmul %80, %81, %cst_36 {dimension_numbers = #tpu.dot_dimension_numbers<[2], [1], [1], [2], [0, 0, 0, 1, 1, 2], [0], [0]>} : vector<2x8x8xbf16>, vector<2x8x16xbf16>, vector<2x8x16xf32> -> vector<2x8x16xf32>
    "tpu.trace_stop"() : () -> ()
    %83 = tpu.concatenate %54, %82 in 2 : vector<2x8x16xf32>, vector<2x8x16xf32> -> vector<2x8x32xf32>
    %84 = vector.shape_cast %83 : vector<2x8x32xf32> to vector<16x32xf32>
    %c0_37 = arith.constant 0 : index
    %c0_38 = arith.constant 0 : index
    %85 = vector.load %arg10[%c0_37, %c0_38] : memref<32x32xf32, #tpu.memory_space<vmem>>, vector<32x32xf32>
    %86 = arith.truncf %84 : vector<16x32xf32> to vector<16x32xbf16>
    %87 = arith.truncf %85 : vector<32x32xf32> to vector<32x32xbf16>
    %cst_39 = arith.constant dense<0.000000e+00> : vector<16x32xf32>
    %88 = tpu.matmul %86, %87, %cst_39 {dimension_numbers = #tpu.dot_dimension_numbers<[1], [0], [0], [1], [0, 0, 1, 1], [], []>} : vector<16x32xbf16>, vector<32x32xbf16>, vector<16x32xf32> -> vector<16x32xf32>
    %c0_40 = arith.constant 0 : index
    %c0_41 = arith.constant 0 : index
    %89 = vector.load %arg11[%c0_40, %c0_41] : memref<1x32xf32, #tpu.memory_space<vmem>>, vector<1x32xf32>
    %90 = vector.broadcast %89 : vector<1x32xf32> to vector<16x32xf32>
    %91 = arith.addf %88, %90 : vector<16x32xf32>
    %92 = arith.addf %91, %1 : vector<16x32xf32>
    %c0_42 = arith.constant 0 : index
    %c0_43 = arith.constant 0 : index
    %93 = vector.load %arg12[%c0_42, %c0_43] : memref<1x32xf32, #tpu.memory_space<vmem>>, vector<1x32xf32>
    %c0_44 = arith.constant 0 : index
    %c0_45 = arith.constant 0 : index
    %94 = vector.load %arg13[%c0_44, %c0_45] : memref<1x32xf32, #tpu.memory_space<vmem>>, vector<1x32xf32>
    %cst_46 = arith.constant dense<0.000000e+00> : vector<16xf32>
    %95 = vector.multi_reduction <add>, %92, %cst_46 [1] : vector<16x32xf32> to vector<16xf32>
    %96 = vector.shape_cast %95 : vector<16xf32> to vector<16x1xf32>
    %cst_47 = arith.constant 3.200000e+01 : f32
    %97 = vector.broadcast %cst_47 : f32 to vector<16x1xf32>
    %98 = arith.divf %96, %97 : vector<16x1xf32>
    %99 = vector.broadcast %98 : vector<16x1xf32> to vector<16x32xf32>
    %100 = arith.subf %92, %99 : vector<16x32xf32>
    %101 = arith.mulf %100, %100 : vector<16x32xf32>
    %cst_48 = arith.constant dense<0.000000e+00> : vector<16xf32>
    %102 = vector.multi_reduction <add>, %101, %cst_48 [1] : vector<16x32xf32> to vector<16xf32>
    %103 = vector.shape_cast %102 : vector<16xf32> to vector<16x1xf32>
    %cst_49 = arith.constant 3.200000e+01 : f32
    %104 = vector.broadcast %cst_49 : f32 to vector<16x1xf32>
    %105 = arith.divf %103, %104 : vector<16x1xf32>
    %cst_50 = arith.constant 9.99999974E-6 : f32
    %106 = vector.broadcast %cst_50 : f32 to vector<16x1xf32>
    %107 = arith.addf %105, %106 : vector<16x1xf32>
    %108 = math.rsqrt %107 : vector<16x1xf32>
    %109 = vector.broadcast %108 : vector<16x1xf32> to vector<16x32xf32>
    %110 = arith.mulf %100, %109 : vector<16x32xf32>
    %111 = vector.broadcast %93 : vector<1x32xf32> to vector<16x32xf32>
    %112 = arith.mulf %110, %111 : vector<16x32xf32>
    %113 = vector.broadcast %94 : vector<1x32xf32> to vector<16x32xf32>
    %114 = arith.addf %112, %113 : vector<16x32xf32>
    %115 = vector.shape_cast %114 : vector<16x32xf32> to vector<2x1x256xf32>
    %c0_51 = arith.constant 0 : index
    %c0_52 = arith.constant 0 : index
    %c0_53 = arith.constant 0 : index
    %116 = vector.load %arg14[%c0_51, %c0_52, %c0_53] : memref<2x1x256xf32, #tpu.memory_space<vmem>>, vector<2x1x256xf32>
    tpu.vector_store %arg14[%c0_51, %c0_52, %c0_53], %115 {strides = array<i32>} : memref<2x1x256xf32, #tpu.memory_space<vmem>>, vector<2x1x256xf32>,
    return
  }
  func.func @transform_0(%arg0: i32) -> (i32, i32, i32) {
    %c0_i32 = arith.constant 0 : i32
    %c0_i32_0 = arith.constant 0 : i32
    %c0_i32_1 = arith.constant 0 : i32
    return %arg0, %c0_i32, %c0_i32_0 : i32, i32, i32
  }
  func.func @transform_1(%arg0: i32) -> (i32, i32, i32) {
    %c0_i32 = arith.constant 0 : i32
    %c0_i32_0 = arith.constant 0 : i32
    %c0_i32_1 = arith.constant 0 : i32
    return %arg0, %c0_i32, %c0_i32_0 : i32, i32, i32
  }
  func.func @transform_2(%arg0: i32) -> (i32, i32, i32) {
    %c0_i32 = arith.constant 0 : i32
    %c0_i32_0 = arith.constant 0 : i32
    %c0_i32_1 = arith.constant 0 : i32
    return %arg0, %c0_i32, %c0_i32_0 : i32, i32, i32
  }
  func.func @transform_3(%arg0: i32) -> (i32, i32) {
    %c0_i32 = arith.constant 0 : i32
    %c0_i32_0 = arith.constant 0 : i32
    %c0_i32_1 = arith.constant 0 : i32
    return %c0_i32, %c0_i32_0 : i32, i32
  }
  func.func @transform_4(%arg0: i32) -> (i32, i32) {
    %c0_i32 = arith.constant 0 : i32
    %c0_i32_0 = arith.constant 0 : i32
    %c0_i32_1 = arith.constant 0 : i32
    return %c0_i32, %c0_i32_0 : i32, i32
  }
  func.func @transform_5(%arg0: i32) -> (i32, i32) {
    %c0_i32 = arith.constant 0 : i32
    %c0_i32_0 = arith.constant 0 : i32
    %c0_i32_1 = arith.constant 0 : i32
    return %c0_i32, %c0_i32_0 : i32, i32
  }
  func.func @transform_6(%arg0: i32) -> (i32, i32) {
    %c0_i32 = arith.constant 0 : i32
    %c0_i32_0 = arith.constant 0 : i32
    %c0_i32_1 = arith.constant 0 : i32
    return %c0_i32, %c0_i32_0 : i32, i32
  }
  func.func @transform_7(%arg0: i32) -> (i32, i32) {
    %c0_i32 = arith.constant 0 : i32
    %c0_i32_0 = arith.constant 0 : i32
    %c0_i32_1 = arith.constant 0 : i32
    return %c0_i32, %c0_i32_0 : i32, i32
  }
  func.func @transform_8(%arg0: i32) -> (i32, i32) {
    %c0_i32 = arith.constant 0 : i32
    %c0_i32_0 = arith.constant 0 : i32
    %c0_i32_1 = arith.constant 0 : i32
    return %c0_i32, %c0_i32_0 : i32, i32
  }
  func.func @transform_9(%arg0: i32) -> (i32, i32) {
    %c0_i32 = arith.constant 0 : i32
    %c0_i32_0 = arith.constant 0 : i32
    %c0_i32_1 = arith.constant 0 : i32
    return %c0_i32, %c0_i32_0 : i32, i32
  }
  func.func @transform_10(%arg0: i32) -> (i32, i32) {
    %c0_i32 = arith.constant 0 : i32
    %c0_i32_0 = arith.constant 0 : i32
    %c0_i32_1 = arith.constant 0 : i32
    return %c0_i32, %c0_i32_0 : i32, i32
  }
  func.func @transform_11(%arg0: i32) -> (i32, i32) {
    %c0_i32 = arith.constant 0 : i32
    %c0_i32_0 = arith.constant 0 : i32
    %c0_i32_1 = arith.constant 0 : i32
    return %c0_i32, %c0_i32_0 : i32, i32
  }
  func.func @transform_12(%arg0: i32) -> (i32, i32) {
    %c0_i32 = arith.constant 0 : i32
    %c0_i32_0 = arith.constant 0 : i32
    %c0_i32_1 = arith.constant 0 : i32
    return %c0_i32, %c0_i32_0 : i32, i32
  }
  func.func @transform_13(%arg0: i32) -> (i32, i32, i32) {
    %c0_i32 = arith.constant 0 : i32
    %c0_i32_0 = arith.constant 0 : i32
    %c0_i32_1 = arith.constant 0 : i32
    return %arg0, %c0_i32, %c0_i32_0 : i32, i32, i32
  }
  func.func @transform_14(%arg0: i32) -> (i32, i32, i32) {
    %c0_i32 = arith.constant 0 : i32
    %c0_i32_0 = arith.constant 0 : i32
    %c0_i32_1 = arith.constant 0 : i32
    return %arg0, %c0_i32, %c0_i32_0 : i32, i32, i32
  }
}

module attributes {stable_mosaic.version = 11 : i64} {
  func.func @_mha_kernel(%arg0: i32, %arg1: memref<2x8x32xf32, #tpu.memory_space<vmem>>, %arg2: memref<2x8x32xf32, #tpu.memory_space<vmem>>, %arg3: memref<2x8x32xf32, #tpu.memory_space<vmem>>, %arg4: memref<32x32xf32, #tpu.memory_space<vmem>>, %arg5: memref<1x32xf32, #tpu.memory_space<vmem>>, %arg6: memref<32x32xf32, #tpu.memory_space<vmem>>, %arg7: memref<1x32xf32, #tpu.memory_space<vmem>>, %arg8: memref<32x32xf32, #tpu.memory_space<vmem>>, %arg9: memref<1x32xf32, #tpu.memory_space<vmem>>, %arg10: memref<32x32xf32, #tpu.memory_space<vmem>>, %arg11: memref<1x32xf32, #tpu.memory_space<vmem>>, %arg12: memref<1x32xf32, #tpu.memory_space<vmem>>, %arg13: memref<1x32xf32, #tpu.memory_space<vmem>>, %arg14: memref<2x8x32xf32, #tpu.memory_space<vmem>>, %arg15: memref<2x2x8x8xf32, #tpu.memory_space<vmem>>) attributes {dimension_semantics = [#tpu.dimension_semantics<parallel>], iteration_bounds = array<i64: 1>, scalar_prefetch = 0 : i64, scratch_operands = 0 : i64, tpu.core_type = #tpu.core_type<tc>, window_params = [{transform_indices = @transform_0, window_bounds = array<i64: 2, 8, 32>}, {transform_indices = @transform_1, window_bounds = array<i64: 2, 8, 32>}, {transform_indices = @transform_2, window_bounds = array<i64: 2, 8, 32>}, {pipeline_mode = #tpu.pipeline_mode<synchronous>, transform_indices = @transform_3, window_bounds = array<i64: 32, 32>}, {pipeline_mode = #tpu.pipeline_mode<synchronous>, transform_indices = @transform_4, window_bounds = array<i64: 1, 32>}, {pipeline_mode = #tpu.pipeline_mode<synchronous>, transform_indices = @transform_5, window_bounds = array<i64: 32, 32>}, {pipeline_mode = #tpu.pipeline_mode<synchronous>, transform_indices = @transform_6, window_bounds = array<i64: 1, 32>}, {pipeline_mode = #tpu.pipeline_mode<synchronous>, transform_indices = @transform_7, window_bounds = array<i64: 32, 32>}, {pipeline_mode = #tpu.pipeline_mode<synchronous>, transform_indices = @transform_8, window_bounds = array<i64: 1, 32>}, {pipeline_mode = #tpu.pipeline_mode<synchronous>, transform_indices = @transform_9, window_bounds = array<i64: 32, 32>}, {pipeline_mode = #tpu.pipeline_mode<synchronous>, transform_indices = @transform_10, window_bounds = array<i64: 1, 32>}, {pipeline_mode = #tpu.pipeline_mode<synchronous>, transform_indices = @transform_11, window_bounds = array<i64: 1, 32>}, {pipeline_mode = #tpu.pipeline_mode<synchronous>, transform_indices = @transform_12, window_bounds = array<i64: 1, 32>}, {transform_indices = @transform_13, window_bounds = array<i64: 2, 8, 32>}, {transform_indices = @transform_14, window_bounds = array<i64: 2, 2, 8, 8>}]} {
    %c0 = arith.constant 0 : index
    %c0_0 = arith.constant 0 : index
    %c0_1 = arith.constant 0 : index
    %0 = vector.load %arg1[%c0, %c0_0, %c0_1] : memref<2x8x32xf32, #tpu.memory_space<vmem>>, vector<2x8x32xf32>
    %1 = vector.shape_cast %0 : vector<2x8x32xf32> to vector<16x32xf32>
    %c0_2 = arith.constant 0 : index
    %c0_3 = arith.constant 0 : index
    %2 = vector.load %arg4[%c0_2, %c0_3] : memref<32x32xf32, #tpu.memory_space<vmem>>, vector<32x32xf32>
    %3 = arith.truncf %1 : vector<16x32xf32> to vector<16x32xbf16>
    %4 = arith.truncf %2 : vector<32x32xf32> to vector<32x32xbf16>
    %cst = arith.constant dense<0.000000e+00> : vector<16x32xf32>
    %5 = tpu.matmul %3, %4, %cst {dimension_numbers = #tpu.dot_dimension_numbers<[1], [0], [0], [1], [0, 0, 1, 1], [], []>} : vector<16x32xbf16>, vector<32x32xbf16>, vector<16x32xf32> -> vector<16x32xf32>
    %c0_4 = arith.constant 0 : index
    %c0_5 = arith.constant 0 : index
    %6 = vector.load %arg5[%c0_4, %c0_5] : memref<1x32xf32, #tpu.memory_space<vmem>>, vector<1x32xf32>
    %7 = vector.broadcast %6 : vector<1x32xf32> to vector<16x32xf32>
    %8 = arith.addf %5, %7 : vector<16x32xf32>
    %c0_6 = arith.constant 0 : index
    %c0_7 = arith.constant 0 : index
    %c0_8 = arith.constant 0 : index
    %9 = vector.load %arg2[%c0_6, %c0_7, %c0_8] : memref<2x8x32xf32, #tpu.memory_space<vmem>>, vector<2x8x32xf32>
    %10 = vector.shape_cast %9 : vector<2x8x32xf32> to vector<16x32xf32>
    %c0_9 = arith.constant 0 : index
    %c0_10 = arith.constant 0 : index
    %11 = vector.load %arg6[%c0_9, %c0_10] : memref<32x32xf32, #tpu.memory_space<vmem>>, vector<32x32xf32>
    %12 = arith.truncf %10 : vector<16x32xf32> to vector<16x32xbf16>
    %13 = arith.truncf %11 : vector<32x32xf32> to vector<32x32xbf16>
    %cst_11 = arith.constant dense<0.000000e+00> : vector<16x32xf32>
    %14 = tpu.matmul %12, %13, %cst_11 {dimension_numbers = #tpu.dot_dimension_numbers<[1], [0], [0], [1], [0, 0, 1, 1], [], []>} : vector<16x32xbf16>, vector<32x32xbf16>, vector<16x32xf32> -> vector<16x32xf32>
    %c0_12 = arith.constant 0 : index
    %c0_13 = arith.constant 0 : index
    %15 = vector.load %arg7[%c0_12, %c0_13] : memref<1x32xf32, #tpu.memory_space<vmem>>, vector<1x32xf32>
    %16 = vector.broadcast %15 : vector<1x32xf32> to vector<16x32xf32>
    %17 = arith.addf %14, %16 : vector<16x32xf32>
    %c0_14 = arith.constant 0 : index
    %c0_15 = arith.constant 0 : index
    %c0_16 = arith.constant 0 : index
    %18 = vector.load %arg3[%c0_14, %c0_15, %c0_16] : memref<2x8x32xf32, #tpu.memory_space<vmem>>, vector<2x8x32xf32>
    %19 = vector.shape_cast %18 : vector<2x8x32xf32> to vector<16x32xf32>
    %c0_17 = arith.constant 0 : index
    %c0_18 = arith.constant 0 : index
    %20 = vector.load %arg8[%c0_17, %c0_18] : memref<32x32xf32, #tpu.memory_space<vmem>>, vector<32x32xf32>
    %21 = arith.truncf %19 : vector<16x32xf32> to vector<16x32xbf16>
    %22 = arith.truncf %20 : vector<32x32xf32> to vector<32x32xbf16>
    %cst_19 = arith.constant dense<0.000000e+00> : vector<16x32xf32>
    %23 = tpu.matmul %21, %22, %cst_19 {dimension_numbers = #tpu.dot_dimension_numbers<[1], [0], [0], [1], [0, 0, 1, 1], [], []>} : vector<16x32xbf16>, vector<32x32xbf16>, vector<16x32xf32> -> vector<16x32xf32>
    %c0_20 = arith.constant 0 : index
    %c0_21 = arith.constant 0 : index
    %24 = vector.load %arg9[%c0_20, %c0_21] : memref<1x32xf32, #tpu.memory_space<vmem>>, vector<1x32xf32>
    %25 = vector.broadcast %24 : vector<1x32xf32> to vector<16x32xf32>
    %26 = arith.addf %23, %25 : vector<16x32xf32>
    %27 = vector.extract_strided_slice %8 {offsets = [0, 0], sizes = [16, 16], strides = [1, 1]} : vector<16x32xf32> to vector<16x16xf32>
    %28 = vector.shape_cast %27 : vector<16x16xf32> to vector<2x8x16xf32>
    %29 = vector.extract_strided_slice %17 {offsets = [0, 0], sizes = [16, 16], strides = [1, 1]} : vector<16x32xf32> to vector<16x16xf32>
    %30 = vector.shape_cast %29 : vector<16x16xf32> to vector<2x8x16xf32>
    %31 = vector.extract_strided_slice %26 {offsets = [0, 0], sizes = [16, 16], strides = [1, 1]} : vector<16x32xf32> to vector<16x16xf32>
    %32 = vector.shape_cast %31 : vector<16x16xf32> to vector<2x8x16xf32>
    %33 = arith.truncf %28 : vector<2x8x16xf32> to vector<2x8x16xbf16>
    %34 = arith.truncf %30 : vector<2x8x16xf32> to vector<2x8x16xbf16>
    "tpu.trace_start"() <{level = 10 : i32, message = "bqd,bkd->bqk"}> : () -> ()
    %cst_22 = arith.constant dense<0.000000e+00> : vector<2x8x8xf32>
    %35 = tpu.matmul %33, %34, %cst_22 {dimension_numbers = #tpu.dot_dimension_numbers<[2], [2], [1], [1], [0, 0, 0, 1, 1, 1], [0], [0]>} : vector<2x8x16xbf16>, vector<2x8x16xbf16>, vector<2x8x8xf32> -> vector<2x8x8xf32>
    "tpu.trace_stop"() : () -> ()
    %cst_23 = arith.constant 2.500000e-01 : f32
    %36 = vector.broadcast %cst_23 : f32 to vector<2x8x8xf32>
    %37 = arith.mulf %35, %36 : vector<2x8x8xf32>
    %cst_24 = arith.constant dense<0xFF800000> : vector<2x8xf32>
    %38 = vector.multi_reduction <maximumf>, %37, %cst_24 [2] : vector<2x8x8xf32> to vector<2x8xf32>
    %39 = vector.shape_cast %38 : vector<2x8xf32> to vector<2x8x1xf32>
    %40 = vector.broadcast %39 : vector<2x8x1xf32> to vector<2x8x8xf32>
    %41 = arith.subf %37, %40 : vector<2x8x8xf32>
    %42 = math.exp %41 : vector<2x8x8xf32>
    %cst_25 = arith.constant dense<0.000000e+00> : vector<2x8xf32>
    %43 = vector.multi_reduction <add>, %42, %cst_25 [2] : vector<2x8x8xf32> to vector<2x8xf32>
    %44 = vector.shape_cast %43 : vector<2x8xf32> to vector<2x8x1xf32>
    %45 = tpu.reciprocal %44 {approx = true} : vector<2x8x1xf32> -> vector<2x8x1xf32>
    %46 = vector.broadcast %45 : vector<2x8x1xf32> to vector<2x8x8xf32>
    %47 = arith.mulf %42, %46 : vector<2x8x8xf32>
    %c0_26 = arith.constant 0 : index
    %c0_27 = arith.constant 0 : index
    %c0_28 = arith.constant 0 : index
    %c0_29 = arith.constant 0 : index
    %48 = vector.load %arg15[%c0_26, %c0_27, %c0_28, %c0_29] : memref<2x2x8x8xf32, #tpu.memory_space<vmem>>, vector<2x1x8x8xf32>
    %49 = vector.shape_cast %48 : vector<2x1x8x8xf32> to vector<2x8x8xf32>
    %50 = vector.shape_cast %47 : vector<2x8x8xf32> to vector<2x1x8x8xf32>
    tpu.vector_store %arg15[%c0_26, %c0_27, %c0_28, %c0_29], %50 {strides = array<i32>} : memref<2x2x8x8xf32, #tpu.memory_space<vmem>>, vector<2x1x8x8xf32>,
    %51 = arith.truncf %47 : vector<2x8x8xf32> to vector<2x8x8xbf16>
    %52 = arith.truncf %32 : vector<2x8x16xf32> to vector<2x8x16xbf16>
    "tpu.trace_start"() <{level = 10 : i32, message = "bqk,bkd->bqd"}> : () -> ()
    %cst_30 = arith.constant dense<0.000000e+00> : vector<2x8x16xf32>
    %53 = tpu.matmul %51, %52, %cst_30 {dimension_numbers = #tpu.dot_dimension_numbers<[2], [1], [1], [2], [0, 0, 0, 1, 1, 2], [0], [0]>} : vector<2x8x8xbf16>, vector<2x8x16xbf16>, vector<2x8x16xf32> -> vector<2x8x16xf32>
    "tpu.trace_stop"() : () -> ()
    %54 = vector.extract_strided_slice %8 {offsets = [0, 16], sizes = [16, 16], strides = [1, 1]} : vector<16x32xf32> to vector<16x16xf32>
    %55 = vector.shape_cast %54 : vector<16x16xf32> to vector<2x8x16xf32>
    %56 = vector.extract_strided_slice %17 {offsets = [0, 16], sizes = [16, 16], strides = [1, 1]} : vector<16x32xf32> to vector<16x16xf32>
    %57 = vector.shape_cast %56 : vector<16x16xf32> to vector<2x8x16xf32>
    %58 = vector.extract_strided_slice %26 {offsets = [0, 16], sizes = [16, 16], strides = [1, 1]} : vector<16x32xf32> to vector<16x16xf32>
    %59 = vector.shape_cast %58 : vector<16x16xf32> to vector<2x8x16xf32>
    %60 = arith.truncf %55 : vector<2x8x16xf32> to vector<2x8x16xbf16>
    %61 = arith.truncf %57 : vector<2x8x16xf32> to vector<2x8x16xbf16>
    "tpu.trace_start"() <{level = 10 : i32, message = "bqd,bkd->bqk"}> : () -> ()
    %cst_31 = arith.constant dense<0.000000e+00> : vector<2x8x8xf32>
    %62 = tpu.matmul %60, %61, %cst_31 {dimension_numbers = #tpu.dot_dimension_numbers<[2], [2], [1], [1], [0, 0, 0, 1, 1, 1], [0], [0]>} : vector<2x8x16xbf16>, vector<2x8x16xbf16>, vector<2x8x8xf32> -> vector<2x8x8xf32>
    "tpu.trace_stop"() : () -> ()
    %cst_32 = arith.constant 2.500000e-01 : f32
    %63 = vector.broadcast %cst_32 : f32 to vector<2x8x8xf32>
    %64 = arith.mulf %62, %63 : vector<2x8x8xf32>
    %cst_33 = arith.constant dense<0xFF800000> : vector<2x8xf32>
    %65 = vector.multi_reduction <maximumf>, %64, %cst_33 [2] : vector<2x8x8xf32> to vector<2x8xf32>
    %66 = vector.shape_cast %65 : vector<2x8xf32> to vector<2x8x1xf32>
    %67 = vector.broadcast %66 : vector<2x8x1xf32> to vector<2x8x8xf32>
    %68 = arith.subf %64, %67 : vector<2x8x8xf32>
    %69 = math.exp %68 : vector<2x8x8xf32>
    %cst_34 = arith.constant dense<0.000000e+00> : vector<2x8xf32>
    %70 = vector.multi_reduction <add>, %69, %cst_34 [2] : vector<2x8x8xf32> to vector<2x8xf32>
    %71 = vector.shape_cast %70 : vector<2x8xf32> to vector<2x8x1xf32>
    %72 = tpu.reciprocal %71 {approx = true} : vector<2x8x1xf32> -> vector<2x8x1xf32>
    %73 = vector.broadcast %72 : vector<2x8x1xf32> to vector<2x8x8xf32>
    %74 = arith.mulf %69, %73 : vector<2x8x8xf32>
    %c0_35 = arith.constant 0 : index
    %c1 = arith.constant 1 : index
    %c0_36 = arith.constant 0 : index
    %c0_37 = arith.constant 0 : index
    %75 = vector.load %arg15[%c0_35, %c1, %c0_36, %c0_37] : memref<2x2x8x8xf32, #tpu.memory_space<vmem>>, vector<2x1x8x8xf32>
    %76 = vector.shape_cast %75 : vector<2x1x8x8xf32> to vector<2x8x8xf32>
    %77 = vector.shape_cast %74 : vector<2x8x8xf32> to vector<2x1x8x8xf32>
    tpu.vector_store %arg15[%c0_35, %c1, %c0_36, %c0_37], %77 {strides = array<i32>} : memref<2x2x8x8xf32, #tpu.memory_space<vmem>>, vector<2x1x8x8xf32>,
    %78 = arith.truncf %74 : vector<2x8x8xf32> to vector<2x8x8xbf16>
    %79 = arith.truncf %59 : vector<2x8x16xf32> to vector<2x8x16xbf16>
    "tpu.trace_start"() <{level = 10 : i32, message = "bqk,bkd->bqd"}> : () -> ()
    %cst_38 = arith.constant dense<0.000000e+00> : vector<2x8x16xf32>
    %80 = tpu.matmul %78, %79, %cst_38 {dimension_numbers = #tpu.dot_dimension_numbers<[2], [1], [1], [2], [0, 0, 0, 1, 1, 2], [0], [0]>} : vector<2x8x8xbf16>, vector<2x8x16xbf16>, vector<2x8x16xf32> -> vector<2x8x16xf32>
    "tpu.trace_stop"() : () -> ()
    %81 = tpu.concatenate %53, %80 in 2 : vector<2x8x16xf32>, vector<2x8x16xf32> -> vector<2x8x32xf32>
    %82 = vector.shape_cast %81 : vector<2x8x32xf32> to vector<16x32xf32>
    %c0_39 = arith.constant 0 : index
    %c0_40 = arith.constant 0 : index
    %83 = vector.load %arg10[%c0_39, %c0_40] : memref<32x32xf32, #tpu.memory_space<vmem>>, vector<32x32xf32>
    %84 = arith.truncf %82 : vector<16x32xf32> to vector<16x32xbf16>
    %85 = arith.truncf %83 : vector<32x32xf32> to vector<32x32xbf16>
    %cst_41 = arith.constant dense<0.000000e+00> : vector<16x32xf32>
    %86 = tpu.matmul %84, %85, %cst_41 {dimension_numbers = #tpu.dot_dimension_numbers<[1], [0], [0], [1], [0, 0, 1, 1], [], []>} : vector<16x32xbf16>, vector<32x32xbf16>, vector<16x32xf32> -> vector<16x32xf32>
    %c0_42 = arith.constant 0 : index
    %c0_43 = arith.constant 0 : index
    %87 = vector.load %arg11[%c0_42, %c0_43] : memref<1x32xf32, #tpu.memory_space<vmem>>, vector<1x32xf32>
    %88 = vector.broadcast %87 : vector<1x32xf32> to vector<16x32xf32>
    %89 = arith.addf %86, %88 : vector<16x32xf32>
    %90 = arith.addf %89, %1 : vector<16x32xf32>
    %c0_44 = arith.constant 0 : index
    %c0_45 = arith.constant 0 : index
    %91 = vector.load %arg12[%c0_44, %c0_45] : memref<1x32xf32, #tpu.memory_space<vmem>>, vector<1x32xf32>
    %c0_46 = arith.constant 0 : index
    %c0_47 = arith.constant 0 : index
    %92 = vector.load %arg13[%c0_46, %c0_47] : memref<1x32xf32, #tpu.memory_space<vmem>>, vector<1x32xf32>
    %cst_48 = arith.constant dense<0.000000e+00> : vector<16xf32>
    %93 = vector.multi_reduction <add>, %90, %cst_48 [1] : vector<16x32xf32> to vector<16xf32>
    %94 = vector.shape_cast %93 : vector<16xf32> to vector<16x1xf32>
    %cst_49 = arith.constant 3.200000e+01 : f32
    %95 = vector.broadcast %cst_49 : f32 to vector<16x1xf32>
    %96 = arith.divf %94, %95 : vector<16x1xf32>
    %97 = vector.broadcast %96 : vector<16x1xf32> to vector<16x32xf32>
    %98 = arith.subf %90, %97 : vector<16x32xf32>
    %99 = arith.mulf %98, %98 : vector<16x32xf32>
    %cst_50 = arith.constant dense<0.000000e+00> : vector<16xf32>
    %100 = vector.multi_reduction <add>, %99, %cst_50 [1] : vector<16x32xf32> to vector<16xf32>
    %101 = vector.shape_cast %100 : vector<16xf32> to vector<16x1xf32>
    %cst_51 = arith.constant 3.200000e+01 : f32
    %102 = vector.broadcast %cst_51 : f32 to vector<16x1xf32>
    %103 = arith.divf %101, %102 : vector<16x1xf32>
    %cst_52 = arith.constant 9.99999974E-6 : f32
    %104 = vector.broadcast %cst_52 : f32 to vector<16x1xf32>
    %105 = arith.addf %103, %104 : vector<16x1xf32>
    %106 = math.rsqrt %105 : vector<16x1xf32>
    %107 = vector.broadcast %106 : vector<16x1xf32> to vector<16x32xf32>
    %108 = arith.mulf %98, %107 : vector<16x32xf32>
    %109 = vector.broadcast %91 : vector<1x32xf32> to vector<16x32xf32>
    %110 = arith.mulf %108, %109 : vector<16x32xf32>
    %111 = vector.broadcast %92 : vector<1x32xf32> to vector<16x32xf32>
    %112 = arith.addf %110, %111 : vector<16x32xf32>
    %113 = vector.shape_cast %112 : vector<16x32xf32> to vector<2x8x32xf32>
    %c0_53 = arith.constant 0 : index
    %c0_54 = arith.constant 0 : index
    %c0_55 = arith.constant 0 : index
    %114 = vector.load %arg14[%c0_53, %c0_54, %c0_55] : memref<2x8x32xf32, #tpu.memory_space<vmem>>, vector<2x8x32xf32>
    tpu.vector_store %arg14[%c0_53, %c0_54, %c0_55], %113 {strides = array<i32>} : memref<2x8x32xf32, #tpu.memory_space<vmem>>, vector<2x8x32xf32>,
    return
  }
  func.func @transform_0(%arg0: i32) -> (i32, i32, i32) {
    %c0_i32 = arith.constant 0 : i32
    %c0_i32_0 = arith.constant 0 : i32
    %c0_i32_1 = arith.constant 0 : i32
    return %arg0, %c0_i32, %c0_i32_0 : i32, i32, i32
  }
  func.func @transform_1(%arg0: i32) -> (i32, i32, i32) {
    %c0_i32 = arith.constant 0 : i32
    %c0_i32_0 = arith.constant 0 : i32
    %c0_i32_1 = arith.constant 0 : i32
    return %arg0, %c0_i32, %c0_i32_0 : i32, i32, i32
  }
  func.func @transform_2(%arg0: i32) -> (i32, i32, i32) {
    %c0_i32 = arith.constant 0 : i32
    %c0_i32_0 = arith.constant 0 : i32
    %c0_i32_1 = arith.constant 0 : i32
    return %arg0, %c0_i32, %c0_i32_0 : i32, i32, i32
  }
  func.func @transform_3(%arg0: i32) -> (i32, i32) {
    %c0_i32 = arith.constant 0 : i32
    %c0_i32_0 = arith.constant 0 : i32
    %c0_i32_1 = arith.constant 0 : i32
    return %c0_i32, %c0_i32_0 : i32, i32
  }
  func.func @transform_4(%arg0: i32) -> (i32, i32) {
    %c0_i32 = arith.constant 0 : i32
    %c0_i32_0 = arith.constant 0 : i32
    %c0_i32_1 = arith.constant 0 : i32
    return %c0_i32, %c0_i32_0 : i32, i32
  }
  func.func @transform_5(%arg0: i32) -> (i32, i32) {
    %c0_i32 = arith.constant 0 : i32
    %c0_i32_0 = arith.constant 0 : i32
    %c0_i32_1 = arith.constant 0 : i32
    return %c0_i32, %c0_i32_0 : i32, i32
  }
  func.func @transform_6(%arg0: i32) -> (i32, i32) {
    %c0_i32 = arith.constant 0 : i32
    %c0_i32_0 = arith.constant 0 : i32
    %c0_i32_1 = arith.constant 0 : i32
    return %c0_i32, %c0_i32_0 : i32, i32
  }
  func.func @transform_7(%arg0: i32) -> (i32, i32) {
    %c0_i32 = arith.constant 0 : i32
    %c0_i32_0 = arith.constant 0 : i32
    %c0_i32_1 = arith.constant 0 : i32
    return %c0_i32, %c0_i32_0 : i32, i32
  }
  func.func @transform_8(%arg0: i32) -> (i32, i32) {
    %c0_i32 = arith.constant 0 : i32
    %c0_i32_0 = arith.constant 0 : i32
    %c0_i32_1 = arith.constant 0 : i32
    return %c0_i32, %c0_i32_0 : i32, i32
  }
  func.func @transform_9(%arg0: i32) -> (i32, i32) {
    %c0_i32 = arith.constant 0 : i32
    %c0_i32_0 = arith.constant 0 : i32
    %c0_i32_1 = arith.constant 0 : i32
    return %c0_i32, %c0_i32_0 : i32, i32
  }
  func.func @transform_10(%arg0: i32) -> (i32, i32) {
    %c0_i32 = arith.constant 0 : i32
    %c0_i32_0 = arith.constant 0 : i32
    %c0_i32_1 = arith.constant 0 : i32
    return %c0_i32, %c0_i32_0 : i32, i32
  }
  func.func @transform_11(%arg0: i32) -> (i32, i32) {
    %c0_i32 = arith.constant 0 : i32
    %c0_i32_0 = arith.constant 0 : i32
    %c0_i32_1 = arith.constant 0 : i32
    return %c0_i32, %c0_i32_0 : i32, i32
  }
  func.func @transform_12(%arg0: i32) -> (i32, i32) {
    %c0_i32 = arith.constant 0 : i32
    %c0_i32_0 = arith.constant 0 : i32
    %c0_i32_1 = arith.constant 0 : i32
    return %c0_i32, %c0_i32_0 : i32, i32
  }
  func.func @transform_13(%arg0: i32) -> (i32, i32, i32) {
    %c0_i32 = arith.constant 0 : i32
    %c0_i32_0 = arith.constant 0 : i32
    %c0_i32_1 = arith.constant 0 : i32
    return %arg0, %c0_i32, %c0_i32_0 : i32, i32, i32
  }
  func.func @transform_14(%arg0: i32) -> (i32, i32, i32, i32) {
    %c0_i32 = arith.constant 0 : i32
    %c0_i32_0 = arith.constant 0 : i32
    %c0_i32_1 = arith.constant 0 : i32
    %c0_i32_2 = arith.constant 0 : i32
    return %arg0, %c0_i32, %c0_i32_0, %c0_i32_1 : i32, i32, i32, i32
  }
}

</mosaic_0001>

<bundles_post_ra>
// kernel: tpu_custom_call.1
= control target key start
LH: loop header
LB: loop body
LE: loop exit
PB: predicated region body
PF: predicated region fallthrough
CT: control target
= control target key end

     0   :  { %20 = vsyncpa [#allocation3], 0  ;;  %s1954_s0 = inlined_call_operand.hbm [shape: f32[2,8,32], index: 0, kind: input, shape index: {}]   ;;  %s1955_s1 = inlined_call_operand.hbm [shape: f32[2,8,32], index: 1, kind: input, shape index: {}]   ;;  %s1956_s2 = inlined_call_operand.hbm [shape: f32[2,8,32], index: 2, kind: input, shape index: {}]   ;;  %s1957_s3 = inlined_call_operand.hbm [shape: f32[32,32], index: 3, kind: input, shape index: {}]   ;;  %s1958_s4 = inlined_call_operand.hbm [shape: f32[1,32], index: 4, kind: input, shape index: {}]   ;;  %s1959_s5 = inlined_call_operand.hbm [shape: f32[32,32], index: 5, kind: input, shape index: {}]   ;;  %s1960_s6 = inlined_call_operand.hbm [shape: f32[1,32], index: 6, kind: input, shape index: {}]   ;;  %s1961_s7 = inlined_call_operand.hbm [shape: f32[32,32], index: 7, kind: input, shape index: {}]   ;;  %s1962_s8 = inlined_call_operand.hbm [shape: f32[1,32], index: 8, kind: input, shape index: {}]   ;;  %s1963_s9 = inlined_call_operand.hbm [shape: f32[32,32], index: 9, kind: input, shape index: {}]   ;;  %s1964_s10 = inlined_call_operand.hbm [shape: f32[1,32], index: 10, kind: input, shape index: {}]   ;;  %s1965_s11 = inlined_call_operand.hbm [shape: f32[1,32], index: 11, kind: input, shape index: {}]   ;;  %s1966_s12 = inlined_call_operand.hbm [shape: f32[1,32], index: 12, kind: input, shape index: {}]   ;;  %s1967_s13 = inlined_call_operand.hbm [shape: f32[2,8,32], index: 13, kind: output, shape index: {0}]   ;;  %s1968_s14 = inlined_call_operand.hbm [shape: f32[2,2,8,8], index: 14, kind: output, shape index: {1}]  }
   0x1   :  { %21 = vsyncpa [#allocation6], 0 }
   0x2   :  { %22 = vsyncpa [#allocation9], 0 }
   0x3   :  { %23 = vsyncpa [#allocation12], 0 }
   0x4   :  { %24 = vsyncpa [#allocation15], 0 }
   0x5   :  { %25 = vsyncpa [#allocation18], 0 }
   0x6   :  { %26 = vsyncpa [#allocation21], 0 }
   0x7   :  { %27 = vsyncpa [#allocation4], 0 }
   0x8   :  { %28 = vsyncpa [#allocation25], 0  ;;  %s1522_s29 = smov [#allocation5]   ;;  %s1523_s15 = smov [#allocation8]  }
   0x9   :  { %s46_s30 = sshll.u32 %s1522_s29, 4  ;;  %s70_s16 = sshll.u32 %s1523_s15, 4  ;;  %s47_s30 = int_to_ptr.vmem [resolvable:$true] %s46_s30  ;;  %s1618_s16 = int_to_ptr.vmem [resolvable:$true] %s70_s16 }
   0xa   :  { %s1174_s19 = scalar_lea.hbm %s1955_s1, 256 }
   0xb   :  { %p1175_p0 = scmp.ne.s32.totalorder %s1955_s1, %s1174_s19  ;;  %p1178_p1 = scmp.lt.u32.totalorder %s1174_s19, %s1955_s1 }
   0xd   :  { %p1180_p2 = pnand %p1178_p1, %p1175_p0 }
   0xf   :  { %1183 = shalt.err (!%p1180_p2)
}
  0x10   :  { %s1184_s24 = scalar_lea.vmem %s47_s30, 256  ;;  %p1189_p4 = scmp.lt.s32.totalorder %s47_s30, %s47_s30 }
  0x11   :  { %p1185_p3 = scmp.ne.s32.totalorder %s47_s30, %s1184_s24  ;;  %p1190_p5 = scmp.lt.s32.totalorder %s1184_s24, %s1184_s24 }
  0x13   :  { %p1191_p6 = por %p1190_p5, %p1189_p4 }
  0x15   :  { %p1192_p7 = pnand %p1191_p6, %p1185_p3 }
  0x17   :  { %1195 = shalt.err (!%p1192_p7)
}
  0x18   :  { %s1524_s25 = smov 128   ;;  %s1525_s26 = smov 8  }
  0x19   :  { %52 = dma.hbm_to_vmem [thread:$0]  %s1955_s1, 256, %s47_s30, [#allocation6], %s1524_s25, %s1524_s25, %s1525_s26  }
  0x1a   :  { %s1196_s17 = scalar_lea.hbm %s1957_s3, 512 }
  0x1b   :  { %p1197_p8 = scmp.ne.s32.totalorder %s1957_s3, %s1196_s17  ;;  %p1200_p9 = scmp.lt.u32.totalorder %s1196_s17, %s1957_s3 }
  0x1d   :  { %p1202_p10 = pnand %p1200_p9, %p1197_p8 }
  0x1f   :  { %1205 = shalt.err (!%p1202_p10)
}
  0x20   :  { %s1206_s22 = scalar_lea.vmem %s1618_s16, 512  ;;  %p1211_p12 = scmp.lt.s32.totalorder %s1618_s16, %s1618_s16 }
  0x21   :  { %p1207_p11 = scmp.ne.s32.totalorder %s1618_s16, %s1206_s22  ;;  %p1212_p13 = scmp.lt.s32.totalorder %s1206_s22, %s1206_s22 }
  0x23   :  { %p1213_p0 = por %p1212_p13, %p1211_p12 }
  0x25   :  { %p1214_p1 = pnand %p1213_p0, %p1207_p11 }
  0x27   :  { %1217 = shalt.err (!%p1214_p1)
}
  0x28   :  { %76 = dma.hbm_to_vmem [thread:$0]  %s1957_s3, 512, %s1618_s16, [#allocation9], %s1524_s25, %s1524_s25, %s1525_s26  }
  0x29   :  { %s1526_s23 = smov [#allocation11]   ;;  %s1527_s27 = smov [#allocation14]  }
  0x2a   :  { %s92_s24 = sshll.u32 %s1526_s23, 4  ;;  %s114_s28 = sshll.u32 %s1527_s27, 4  ;;  %s93_s24 = int_to_ptr.vmem [resolvable:$true] %s92_s24  ;;  %s1655_s28 = int_to_ptr.vmem [resolvable:$true] %s114_s28 }
  0x2b   :  { %s1218_s17 = scalar_lea.hbm %s1959_s5, 512 }
  0x2c   :  { %p1219_p2 = scmp.ne.s32.totalorder %s1959_s5, %s1218_s17  ;;  %p1222_p3 = scmp.lt.u32.totalorder %s1218_s17, %s1959_s5 }
  0x2e   :  { %p1224_p4 = pnand %p1222_p3, %p1219_p2 }
  0x30   :  { %1227 = shalt.err (!%p1224_p4)
}
  0x31   :  { %s1228_s3 = scalar_lea.vmem %s93_s24, 512  ;;  %p1233_p6 = scmp.lt.s32.totalorder %s93_s24, %s93_s24 }
  0x32   :  { %p1229_p5 = scmp.ne.s32.totalorder %s93_s24, %s1228_s3  ;;  %p1234_p7 = scmp.lt.s32.totalorder %s1228_s3, %s1228_s3 }
  0x34   :  { %p1235_p8 = por %p1234_p7, %p1233_p6 }
  0x36   :  { %p1236_p9 = pnand %p1235_p8, %p1229_p5 }
  0x38   :  { %1239 = shalt.err (!%p1236_p9)
}
  0x39   :  { %98 = dma.hbm_to_vmem [thread:$0]  %s1959_s5, 512, %s93_s24, [#allocation12], %s1524_s25, %s1524_s25, %s1525_s26  }
  0x3a   :  { %s1240_s23 = scalar_lea.hbm %s1961_s7, 512 }
  0x3b   :  { %p1241_p10 = scmp.ne.s32.totalorder %s1961_s7, %s1240_s23  ;;  %p1244_p11 = scmp.lt.u32.totalorder %s1240_s23, %s1961_s7 }
  0x3d   :  { %p1246_p12 = pnand %p1244_p11, %p1241_p10 }
  0x3f   :  { %1249 = shalt.err (!%p1246_p12)
}
  0x40   :  { %s1250_s18 = scalar_lea.vmem %s1655_s28, 512  ;;  %p1255_p0 = scmp.lt.s32.totalorder %s1655_s28, %s1655_s28 }
  0x41   :  { %p1251_p13 = scmp.ne.s32.totalorder %s1655_s28, %s1250_s18  ;;  %p1256_p1 = scmp.lt.s32.totalorder %s1250_s18, %s1250_s18 }
  0x43   :  { %p1257_p2 = por %p1256_p1, %p1255_p0 }
  0x45   :  { %p1258_p3 = pnand %p1257_p2, %p1251_p13 }
  0x47   :  { %1261 = shalt.err (!%p1258_p3)
}
  0x48   :  { %120 = dma.hbm_to_vmem [thread:$0]  %s1961_s7, 512, %s1655_s28, [#allocation15], %s1524_s25, %s1524_s25, %s1525_s26  }
  0x49   :  { %s1528_s19 = smov [#allocation17]   ;;  %s1529_s21 = smov [#allocation20]  }
  0x4a   :  { %s136_s20 = sshll.u32 %s1528_s19, 4  ;;  %s159_s3 = sshll.u32 %s1529_s21, 4  ;;  %s137_s20 = int_to_ptr.vmem [resolvable:$true] %s136_s20  ;;  %s160_s3 = int_to_ptr.vmem [resolvable:$true] %s159_s3 }
  0x4b   :  { %s1262_s1 = scalar_lea.hbm %s1963_s9, 512 }
  0x4c   :  { %p1263_p4 = scmp.ne.s32.totalorder %s1963_s9, %s1262_s1  ;;  %p1266_p5 = scmp.lt.u32.totalorder %s1262_s1, %s1963_s9 }
  0x4e   :  { %p1268_p6 = pnand %p1266_p5, %p1263_p4 }
  0x50   :  { %1271 = shalt.err (!%p1268_p6)
}
  0x51   :  { %s1272_s7 = scalar_lea.vmem %s137_s20, 512  ;;  %p1277_p8 = scmp.lt.s32.totalorder %s137_s20, %s137_s20 }
  0x52   :  { %p1273_p7 = scmp.ne.s32.totalorder %s137_s20, %s1272_s7  ;;  %p1278_p9 = scmp.lt.s32.totalorder %s1272_s7, %s1272_s7 }
  0x54   :  { %p1279_p10 = por %p1278_p9, %p1277_p8 }
  0x56   :  { %p1280_p11 = pnand %p1279_p10, %p1273_p7 }
  0x58   :  { %1283 = shalt.err (!%p1280_p11)
}
  0x59   :  { %142 = dma.hbm_to_vmem [thread:$0]  %s1963_s9, 512, %s137_s20, [#allocation18], %s1524_s25, %s1524_s25, %s1525_s26  }
  0x5a   :  { %s1284_s5 = scalar_lea.hbm %s1965_s11, 16 }
  0x5b   :  { %p1285_p12 = scmp.ne.s32.totalorder %s1965_s11, %s1284_s5  ;;  %p1288_p13 = scmp.lt.u32.totalorder %s1284_s5, %s1965_s11 }
  0x5d   :  { %p1290_p0 = pnand %p1288_p13, %p1285_p12 }
  0x5f   :  { %1293 = shalt.err (!%p1290_p0)
}
  0x60   :  { %s1294_s22 = scalar_lea.vmem %s160_s3, 16  ;;  %s1298_s1 = scalar_lea.vmem %s160_s3, 32 }
  0x61   :  { %p1295_p1 = scmp.ne.s32.totalorder %s160_s3, %s1294_s22  ;;  %p1299_p2 = scmp.lt.s32.totalorder %s160_s3, %s160_s3 }
  0x62   :  { %p1300_p3 = scmp.lt.s32.totalorder %s1298_s1, %s1294_s22 }
  0x64   :  { %p1301_p4 = por %p1300_p3, %p1299_p2 }
  0x66   :  { %p1302_p5 = pnand %p1301_p4, %p1295_p1 }
  0x68   :  { %1305 = shalt.err (!%p1302_p5)
}
  0x69   :  { %162 = dma.hbm_to_vmem [thread:$0]  %s1965_s11, 16, %s160_s3, [#allocation21]  }
  0x6a   :  { %s1530_s30 = smov [#allocation2]   ;;  %s1531_s27 = smov [#allocation7]  }
  0x6b   :  { %s34_s23 = sshll.u32 %s1530_s30, 4  ;;  %s58_s29 = sshll.u32 %s1531_s27, 4  ;;  %s35_s23 = int_to_ptr.vmem [resolvable:$true] %s34_s23  ;;  %s1719_s29 = int_to_ptr.vmem [resolvable:$true] %s58_s29 }
  0x6c   :  { %s1306_s15 = scalar_lea.hbm %s1954_s0, 256 }
  0x6d   :  { %p1307_p6 = scmp.ne.s32.totalorder %s1954_s0, %s1306_s15  ;;  %p1310_p7 = scmp.lt.u32.totalorder %s1306_s15, %s1954_s0 }
  0x6f   :  { %p1312_p8 = pnand %p1310_p7, %p1307_p6 }
  0x71   :  { %1315 = shalt.err (!%p1312_p8)
}
  0x72   :  { %s1316_s11 = scalar_lea.vmem %s35_s23, 256  ;;  %p1321_p10 = scmp.lt.s32.totalorder %s35_s23, %s35_s23 }
  0x73   :  { %p1317_p9 = scmp.ne.s32.totalorder %s35_s23, %s1316_s11  ;;  %p1322_p11 = scmp.lt.s32.totalorder %s1316_s11, %s1316_s11 }
  0x75   :  { %p1323_p12 = por %p1322_p11, %p1321_p10 }
  0x77   :  { %p1324_p13 = pnand %p1323_p12, %p1317_p9 }
  0x79   :  { %1327 = shalt.err (!%p1324_p13)
}
  0x7a   :  { %40 = dma.hbm_to_vmem [thread:$0]  %s1954_s0, 256, %s35_s23, [#allocation3], %s1524_s25, %s1524_s25, %s1525_s26  }
  0x7b   :  { %s1328_s22 = scalar_lea.hbm %s1956_s2, 256 }
  0x7c   :  { %p1329_p0 = scmp.ne.s32.totalorder %s1956_s2, %s1328_s22  ;;  %p1332_p1 = scmp.lt.u32.totalorder %s1328_s22, %s1956_s2 }
  0x7e   :  { %p1334_p2 = pnand %p1332_p1, %p1329_p0 }
  0x80   :  { %1337 = shalt.err (!%p1334_p2)
}
  0x81   :  { %s1338_s27 = scalar_lea.vmem %s1719_s29, 256  ;;  %p1343_p4 = scmp.lt.s32.totalorder %s1719_s29, %s1719_s29 }
  0x82   :  { %p1339_p3 = scmp.ne.s32.totalorder %s1719_s29, %s1338_s27  ;;  %p1344_p5 = scmp.lt.s32.totalorder %s1338_s27, %s1338_s27 }
  0x84   :  { %p1345_p6 = por %p1344_p5, %p1343_p4 }
  0x86   :  { %p1346_p7 = pnand %p1345_p6, %p1339_p3 }
  0x88   :  { %1349 = shalt.err (!%p1346_p7)
}
  0x89   :  { %64 = dma.hbm_to_vmem [thread:$0]  %s1956_s2, 256, %s1719_s29, [#allocation6], %s1524_s25, %s1524_s25, %s1525_s26  }
  0x8a   :  { %s1532_s7 = smov [#allocation10]   ;;  %s1533_s15 = smov [#allocation13]  }
  0x8b   :  { %s83_s28 = sshll.u32 %s1532_s7, 4  ;;  %s105_s17 = sshll.u32 %s1533_s15, 4  ;;  %s84_s28 = int_to_ptr.vmem [resolvable:$true] %s83_s28  ;;  %s106_s17 = int_to_ptr.vmem [resolvable:$true] %s105_s17 }
  0x8c   :  { %s1350_s24 = scalar_lea.hbm %s1958_s4, 16 }
  0x8d   :  { %p1351_p8 = scmp.ne.s32.totalorder %s1958_s4, %s1350_s24  ;;  %p1354_p9 = scmp.lt.u32.totalorder %s1350_s24, %s1958_s4 }
  0x8f   :  { %p1356_p10 = pnand %p1354_p9, %p1351_p8 }
  0x91   :  { %1359 = shalt.err (!%p1356_p10)
}
  0x92   :  { %s1360_s2 = scalar_lea.vmem %s84_s28, 16  ;;  %s1364_s29 = scalar_lea.vmem %s84_s28, 32 }
  0x93   :  { %p1361_p11 = scmp.ne.s32.totalorder %s84_s28, %s1360_s2  ;;  %p1365_p12 = scmp.lt.s32.totalorder %s84_s28, %s84_s28 }
  0x94   :  { %p1366_p13 = scmp.lt.s32.totalorder %s1364_s29, %s1360_s2 }
  0x96   :  { %p1367_p0 = por %p1366_p13, %p1365_p12 }
  0x98   :  { %p1368_p1 = pnand %p1367_p0, %p1361_p11 }
  0x9a   :  { %1371 = shalt.err (!%p1368_p1)
}
  0x9b   :  { %86 = dma.hbm_to_vmem [thread:$0]  %s1958_s4, 16, %s84_s28, [#allocation9]  }
  0x9c   :  { %s1372_s20 = scalar_lea.hbm %s1960_s6, 16 }
  0x9d   :  { %p1373_p2 = scmp.ne.s32.totalorder %s1960_s6, %s1372_s20  ;;  %p1376_p3 = scmp.lt.u32.totalorder %s1372_s20, %s1960_s6 }
  0x9f   :  { %p1378_p4 = pnand %p1376_p3, %p1373_p2 }
  0xa1   :  { %1381 = shalt.err (!%p1378_p4)
}
  0xa2   :  { %s1382_s7 = scalar_lea.vmem %s106_s17, 16  ;;  %s1386_s15 = scalar_lea.vmem %s106_s17, 32 }
  0xa3   :  { %p1383_p5 = scmp.ne.s32.totalorder %s106_s17, %s1382_s7  ;;  %p1387_p6 = scmp.lt.s32.totalorder %s106_s17, %s106_s17 }
  0xa4   :  { %p1388_p7 = scmp.lt.s32.totalorder %s1386_s15, %s1382_s7 }
  0xa6   :  { %p1389_p8 = por %p1388_p7, %p1387_p6 }
  0xa8   :  { %p1390_p9 = pnand %p1389_p8, %p1383_p5 }
  0xaa   :  { %1393 = shalt.err (!%p1390_p9)
}
  0xab   :  { %108 = dma.hbm_to_vmem [thread:$0]  %s1960_s6, 16, %s106_s17, [#allocation12]  }
  0xac   :  { %s1534_s18 = smov [#allocation16]   ;;  %s1535_s24 = smov [#allocation19]  }
  0xad   :  { %s127_s5 = sshll.u32 %s1534_s18, 4  ;;  %s149_s11 = sshll.u32 %s1535_s24, 4  ;;  %s128_s5 = int_to_ptr.vmem [resolvable:$true] %s127_s5  ;;  %s150_s11 = int_to_ptr.vmem [resolvable:$true] %s149_s11 }
  0xae   :  { %s1394_s21 = scalar_lea.hbm %s1962_s8, 16 }
  0xaf   :  { %p1395_p10 = scmp.ne.s32.totalorder %s1962_s8, %s1394_s21  ;;  %p1398_p11 = scmp.lt.u32.totalorder %s1394_s21, %s1962_s8 }
  0xb1   :  { %p1400_p12 = pnand %p1398_p11, %p1395_p10 }
  0xb3   :  { %1403 = shalt.err (!%p1400_p12)
}
  0xb4   :  { %s1404_s6 = scalar_lea.vmem %s128_s5, 16  ;;  %s1408_s17 = scalar_lea.vmem %s128_s5, 32 }
  0xb5   :  { %p1405_p13 = scmp.ne.s32.totalorder %s128_s5, %s1404_s6  ;;  %p1409_p0 = scmp.lt.s32.totalorder %s128_s5, %s128_s5 }
  0xb6   :  { %p1410_p1 = scmp.lt.s32.totalorder %s1408_s17, %s1404_s6 }
  0xb8   :  { %p1411_p2 = por %p1410_p1, %p1409_p0 }
  0xba   :  { %p1412_p3 = pnand %p1411_p2, %p1405_p13 }
  0xbc   :  { %1415 = shalt.err (!%p1412_p3)
}
  0xbd   :  { %130 = dma.hbm_to_vmem [thread:$0]  %s1962_s8, 16, %s128_s5, [#allocation15]  }
  0xbe   :  { %s1416_s27 = scalar_lea.hbm %s1964_s10, 16 }
  0xbf   :  { %p1417_p4 = scmp.ne.s32.totalorder %s1964_s10, %s1416_s27  ;;  %p1420_p5 = scmp.lt.u32.totalorder %s1416_s27, %s1964_s10 }
  0xc1   :  { %p1422_p6 = pnand %p1420_p5, %p1417_p4 }
  0xc3   :  { %1425 = shalt.err (!%p1422_p6)
}
  0xc4   :  { %s1426_s4 = scalar_lea.vmem %s150_s11, 16  ;;  %s1430_s28 = scalar_lea.vmem %s150_s11, 32 }
  0xc5   :  { %p1427_p7 = scmp.ne.s32.totalorder %s150_s11, %s1426_s4  ;;  %p1431_p8 = scmp.lt.s32.totalorder %s150_s11, %s150_s11 }
  0xc6   :  { %p1432_p9 = scmp.lt.s32.totalorder %s1430_s28, %s1426_s4 }
  0xc8   :  { %p1433_p10 = por %p1432_p9, %p1431_p8 }
  0xca   :  { %p1434_p11 = pnand %p1433_p10, %p1427_p7 }
  0xcc   :  { %1437 = shalt.err (!%p1434_p11)
}
  0xcd   :  { %152 = dma.hbm_to_vmem [thread:$0]  %s1964_s10, 16, %s150_s11, [#allocation18]  }
  0xce   :  { %s1536_s5 = smov [#allocation22]   ;;  %s1438_s21 = scalar_lea.hbm %s1966_s12, 16 }
  0xcf   :  { %s169_s24 = sshll.u32 %s1536_s5, 4  ;;  %p1439_p12 = scmp.ne.s32.totalorder %s1966_s12, %s1438_s21  ;;  %s170_s24 = int_to_ptr.vmem [resolvable:$true] %s169_s24 }
  0xd0   :  { %p1442_p13 = scmp.lt.u32.totalorder %s1438_s21, %s1966_s12 }
  0xd2   :  { %p1444_p0 = pnand %p1442_p13, %p1439_p12 }
  0xd4   :  { %1447 = shalt.err (!%p1444_p0)
}
  0xd5   :  { %s1448_s6 = scalar_lea.vmem %s170_s24, 16  ;;  %s1452_s10 = scalar_lea.vmem %s170_s24, 32 }
  0xd6   :  { %p1449_p1 = scmp.ne.s32.totalorder %s170_s24, %s1448_s6  ;;  %p1453_p2 = scmp.lt.s32.totalorder %s170_s24, %s170_s24 }
  0xd7   :  { %p1454_p3 = scmp.lt.s32.totalorder %s1452_s10, %s1448_s6 }
  0xd9   :  { %p1455_p4 = por %p1454_p3, %p1453_p2 }
  0xdb   :  { %p1456_p5 = pnand %p1455_p4, %p1449_p1 }
  0xdd   :  { %1459 = shalt.err (!%p1456_p5)
}
  0xde   :  { %172 = dma.hbm_to_vmem [thread:$0]  %s1966_s12, 16, %s170_s24, [#allocation21]  }
  0xdf   :  { %1504 = dma.done.wait [#allocation3], 256  }
  0xe0   :  { %1505 = vsyncadd [#allocation3], 4294967040 }
  0xe1   :  { %1506 = dma.done.wait [#allocation6], 512  }
  0xe2   :  { %1507 = vsyncadd [#allocation6], 4294966784 }
  0xe3   :  { %1508 = dma.done.wait [#allocation9], 528  }
  0xe4   :  { %1509 = vsyncadd [#allocation9], 4294966768 }
  0xe5   :  { %1510 = dma.done.wait [#allocation12], 528  }
  0xe6   :  { %1511 = vsyncadd [#allocation12], 4294966768 }
  0xe7   :  { %1512 = dma.done.wait [#allocation15], 528  }
  0xe8   :  { %1513 = vsyncadd [#allocation15], 4294966768 }
  0xe9   :  { %1514 = dma.done.wait [#allocation18], 528  }
  0xea   :  { %1515 = vsyncadd [#allocation18], 4294966768 }
  0xeb   :  { %1516 = dma.done.wait [#allocation21], 32  }
  0xec   :  { %1517 = vsyncadd [#allocation21], 4294967264  ;;  %v1537_v0 = vmov 0.0   ;;  %vm1538_vm0 = vmmov 0   ;;  %v276_v1 = vld [vmem:[#allocation11] sm:$0xff]  ;;  %v277_v2 = vld [vmem:[#allocation11 + $0x8] sm:$0xff] }
  0xed   :  { %1056 = vmatprep.subr.bf16.mxu1 %v1537_v0  ;;  %1048 = vmatprep.subr.bf16.mxu0 %v1537_v0  ;;  %v278_v3 = vld [vmem:[#allocation11 + $0x10] sm:$0xff]  ;;  %v281_v4 = vpack.c.bf16 %v277_v2, %v276_v1  ;;  %v279_v5 = vld [vmem:[#allocation11 + $0x18] sm:$0xff]  ;;  %v216_v7 = vld [vmem:[#allocation8 + $0x8] sm:$0xff]  ;;  %vm229_vm1 = vcmask 261120   ;;  %vm398_vm2 = vcmask 130048   ;;  %s1539_s12 = smov 112  }
  0xee   :  { %1060 = vmatprep.mubr.msk.bf16.mxu1 %vm1538_vm0, %v1537_v0  ;;  %1052 = vmatprep.mubr.msk.bf16.mxu0 %vm1538_vm0, %v1537_v0  ;;  %v215_v6 = vld [vmem:[#allocation8] sm:$0xff]  ;;  %v217_v9 = vld [vmem:[#allocation8 + $0x10] sm:$0xff]  ;;  %v282_v10 = vpack.c.bf16 %v279_v5, %v278_v3  ;;  %v275_v12 = vld [vmem:[#allocation5 + $0x8] sm:$0xff]  ;;  %vm525_vm3 = vcmask 1043456   ;;  %vm493_vm4 = vcmask 64512   ;;  %s1540_s1 = smov 16  }
  0xef   :  { %v220_v8 = vpack.c.bf16 %v216_v7, %v215_v6  ;;  %1057 = vmatpush3.bf16.msra.mxu1 %v281_v4  ;;  %v274_v11 = vld [vmem:[#allocation5] sm:$0xff]  ;;  %v218_v13 = vld [vmem:[#allocation8 + $0x18] sm:$0xff]  ;;  %v1823_v15 = vld [vmem:[#allocation2] sm:$0xff]  ;;  %s1541_s9 = smov [#allocation24]  }
  0xf0   :  { %1058 = vmatprep.subr.bf16.mxu1 %v1537_v0  ;;  %v221_v14 = vpack.c.bf16 %v218_v13, %v217_v9  ;;  %v1825_v16 = vld [vmem:[#allocation2 + $0x8] sm:$0xff]  ;;  %v336_v17 = vld [vmem:[#allocation14] sm:$0xff]  ;;  %v337_v18 = vld [vmem:[#allocation14 + $0x8] sm:$0xff]  ;;  %v280_v19 = vpack.c.bf16 %v275_v12, %v274_v11  ;;  %s980_s20 = sshll.u32 %s1541_s9, 4  ;;  %s981_s20 = int_to_ptr.vmem [resolvable:$true] %s980_s20 }
  0xf1   :  { %1049 = vmatpush3.bf16.msra.mxu0 %v220_v8  ;;  %v219_v20 = vpack.c.bf16 %v1825_v16, %v1823_v15  ;;  %v341_v21 = vpack.c.bf16 %v337_v18, %v336_v17  ;;  %v338_v22 = vld [vmem:[#allocation14 + $0x10] sm:$0xff]  ;;  %v339_v23 = vld [vmem:[#allocation14 + $0x18] sm:$0xff]  ;;  %v1006_v48 = vld [vmem:[#allocation16] ss:$0 sm:$0xff]  ;;  %s1460_s30 = scalar_lea.vmem %s981_s20, 512  ;;  %p1465_p7 = scmp.lt.s32.totalorder %s981_s20, %s981_s20 }
  0xf2   :  { %1050 = vmatprep.subr.bf16.mxu0 %v1537_v0  ;;  %v342_v24 = vpack.c.bf16 %v339_v23, %v338_v22  ;;  %v334_v25 = vld [vmem:[#allocation7] sm:$0xff]  ;;  %v335_v26 = vld [vmem:[#allocation7 + $0x8] sm:$0xff]  ;;  %v1004_v28 = vld [vmem:[#allocation13] ss:$0 sm:$0xff]  ;;  %p1461_p6 = scmp.ne.s32.totalorder %s981_s20, %s1460_s30  ;;  %p1466_p8 = scmp.lt.s32.totalorder %s1460_s30, %s1460_s30 }
  0xf3   :  { %1059 = vmatpush3.bf16.msra.mxu1 %v282_v10  ;;  %v340_v27 = vpack.c.bf16 %v335_v26, %v334_v25  ;;  %v1002_v34 = vld [vmem:[#allocation10] ss:$0 sm:$0xff] }
  0xf4   :  { %1072 = vmatprep.subr.bf16.mxu1 %v1537_v0  ;;  %p1467_p9 = por %p1466_p8, %p1465_p7 }
  0xf5   :  { %1051 = vmatpush3.bf16.msra.mxu0 %v221_v14 }
  0xf6   :  { %1064 = vmatprep.subr.bf16.mxu0 %v1537_v0  ;;  %1061 = vmatmul.mubr.msk.bf16.vlgmr.msra.gmra.mrb[0].mxu1 %vm229_vm1, %v280_v19  ;;  %p1468_p10 = pnand %p1467_p9, %p1461_p6 }
  0xf7   :  { %1074 = vmatprep.mubr.msk.bf16.mxu1 %vm1538_vm0, %v1537_v0 }
  0xf8   :  { %1053 = vmatmul.mubr.msk.bf16.vlgmr.msra.gmra.mrb[0].mxu0 %vm229_vm1, %v219_v20 }
  0xf9   :  { %1065 = vmatpush3.bf16.msra.mxu0 %v341_v21  ;;  %1068 = vmatprep.mubr.msk.bf16.mxu0 %vm1538_vm0, %v1537_v0 }
  0xfa   :  { %1066 = vmatprep.subr.bf16.mxu0 %v1537_v0 }
  0xfd   :  { %1067 = vmatpush3.bf16.msra.mxu0 %v342_v24 }
  0xfe   :  { %1078 = vmatprep.subr.bf16.mxu0 %v1537_v0 }
 0x100   :  { %1069 = vmatmul.mubr.msk.bf16.vlgmr.msra.gmra.mrb[4].mxu0 %vm229_vm1, %v340_v27 }
 0x101   :  { %1080 = vmatprep.mubr.msk.bf16.mxu0 %vm1538_vm0, %v1537_v0 }
 0x1c9   :  { %v327_v29 = vpop.f32.mrb[0].mxu1 }
 0x1ca   :  { %v328_v30 = vadd.f32 %v1004_v28, %v327_v29  ;;  %v1062_v31 = vpop.f32.mrb[1].mxu1 }
 0x1cb   :  { %v267_v32 = vpop.f32.mrb[0].mxu0  ;;  %v330_v33 = vpop.f32.mrb[2].mxu1 }
 0x1cc   :  { %v1054_v35 = vpop.f32.mrb[1].mxu0  ;;  %v396_v36 = vpack.c.bf16 %v328_v30, %v328_v30  ;;  %v331_v37 = vadd.f32 %v1004_v28, %v330_v33  ;;  %v1063_v38 = vpop.f32.mrb[3].mxu1  ;;  %v268_v43 = vadd.f32 %v1002_v34, %v267_v32 }
 0x1cd   :  { %v270_v39 = vpop.f32.mrb[2].mxu0 }
 0x1ce   :  { %v1055_v40 = vpop.f32.mrb[3].mxu0  ;;  %v403_v41 = vsel %vm398_vm2, %v396_v36, 0  ;;  %v397_v42 = vpack.c.bf16 %v331_v37, %v331_v37  ;;  %v394_v45 = vpack.c.bf16 %v268_v43, %v268_v43  ;;  %v271_v46 = vadd.f32 %v1002_v34, %v270_v39 }
 0x1cf   :  { %1073 = vmatpush3.bf16.xpose.msra.mxu1 %v403_v41 }
 0x1d0   :  { %v449_v44 = vsel %vm398_vm2, %v397_v42, 0  ;;  %671 = vrot.lane.b32.xlu1 %v397_v42, %s1539_s12  ;;  %1084 = vmatprep.subr.bf16.mxu1 %v1537_v0  ;;  %v395_v47 = vpack.c.bf16 %v271_v46, %v271_v46 }
 0x1d1   :  { %1079 = vmatpush3.bf16.xpose.msra.mxu0 %v449_v44 }
 0x1d2   :  { %1090 = vmatprep.subr.bf16.mxu0 %v1537_v0 }
 0x1d3   :  { %v387_v49 = vpop.f32.mrb[4].mxu0 }
 0x1d4   :  { %v388_v50 = vadd.f32 %v1006_v48, %v387_v49  ;;  %v1070_v51 = vpop.f32.mrb[5].mxu0 }
 0x1d5   :  { %v390_v52 = vpop.f32.mrb[6].mxu0 }
 0x1d6   :  { %1075 = vmatmul.mubr.msk.bf16.vlgmr.msra.gmra.mrb[4].mxu1 %vm398_vm2, %v394_v45  ;;  %v1854_v53 = vpack.c.bf16 %v388_v50, %v388_v50  ;;  %v391_v54 = vadd.f32 %v1006_v48, %v390_v52  ;;  %v1071_v55 = vpop.f32.mrb[7].mxu0 }
 0x1d7   :  { %1086 = vmatprep.mubr.msk.bf16.mxu1 %vm1538_vm0, %v1537_v0 }
 0x1d8   :  { %1081 = vmatmul.mubr.msk.bf16.vlgmr.msra.gmra.mrb[8].mxu0 %vm398_vm2, %v395_v47  ;;  %v527_v56 = vsel %vm525_vm3, %v1854_v53, 0  ;;  %v1858_v57 = vpack.c.bf16 %v391_v54, %v391_v54 }
 0x1d9   :  { %1092 = vmatprep.mubr.msk.bf16.mxu0 %vm1538_vm0, %v1537_v0  ;;  %1085 = vmatpush3.bf16.msra.mxu1 %v527_v56 }
 0x1da   :  { %v573_v58 = vsel %vm525_vm3, %v1858_v57, 0  ;;  %1096 = vmatprep.subr.bf16.mxu1 %v1537_v0 }
 0x1db   :  { %1091 = vmatpush3.bf16.msra.mxu0 %v573_v58 }
 0x1dc   :  { %1102 = vmatprep.subr.bf16.mxu0 %v1537_v0 }
 0x242   :  { %v672_v20 = vpop.permute.xlu1 %671 }
 0x243   :  { %v677_v31 = vsel %vm398_vm2, %v672_v20, 0 }
 0x2a9   :  { %v439_v59 = vpop.f32.mrb[4].mxu1 }
 0x2aa   :  { %v491_v60 = vmul.f32 0.25, %v439_v59  ;;  %v1076_v61 = vpop.f32.mrb[5].mxu1 }
 0x2ab   :  { %v442_v62 = vpop.f32.mrb[6].mxu1  ;;  %v485_v63 = vpop.f32.mrb[8].mxu0 }
 0x2ac   :  { %v492_v1 = vmul.f32 0.25, %v485_v63  ;;  %v1077_v2 = vpop.f32.mrb[7].mxu1  ;;  %v1082_v3 = vpop.f32.mrb[9].mxu0  ;;  %v494_v4 = vsel %vm493_vm4, %v491_v60, -inf }
 0x2ad   :  { %495 = vmax.xlane.f32.xlu0 %v494_v4  ;;  %v488_v5 = vpop.f32.mrb[10].mxu0 }
 0x2ae   :  { %v1083_v6 = vpop.f32.mrb[11].mxu0  ;;  %v497_v7 = vsel %vm493_vm4, %v492_v1, -inf }
 0x2b1   :  { %498 = vmax.xlane.f32.xlu0 %v497_v7 }
 0x2c7   :  { %619 = vrot.lane.b32.xlu0 %v396_v36, %s1539_s12 }
 0x33a   :  { %v496_v8 = vpop.xlane.xlu0 %495 }
 0x33b   :  { %v500_v9 = vsub.f32 %v491_v60, %v496_v8 }
 0x33d   :  { %v502_v10 = vmul.f32 1.442695, %v500_v9 }
 0x33e   :  { %v499_v11 = vpop.xlane.xlu0 %498 }
 0x33f   :  { %1154 = vpow2.f32 %v502_v10  ;;  %v501_v12 = vsub.f32 %v492_v1, %v499_v11 }
 0x341   :  { %v504_v13 = vmul.f32 1.442695, %v501_v12 }
 0x342   :  { %v620_v25 = vpop.permute.xlu0 %619 }
 0x343   :  { %1156 = vpow2.f32 %v504_v13  ;;  %v625_v28 = vsel %vm398_vm2, %v620_v25, 0  ;;  %v856_v13 = vld [vmem:[#allocation17] sm:$0xff] }
 0x349   :  { %v1155_v14 = vpop.eup %1154 }
 0x34a   :  { %v506_v17 = vsel %vm493_vm4, %v1155_v14, 0.0 }
 0x34b   :  { %507 = vadd.xlane.f32.xlu1 %v506_v17 }
 0x34d   :  { %v1157_v18 = vpop.eup %1156 }
 0x34e   :  { %v509_v19 = vsel %vm493_vm4, %v1157_v18, 0.0 }
 0x34f   :  { %510 = vadd.xlane.f32.xlu1 %v509_v19  ;;  %v859_v19 = vld [vmem:[#allocation17 + $0x18] sm:$0xff] }
 0x360   :  { %616 = vrot.lane.b32.xlu1 %v394_v45, %s1539_s12 }
 0x364   :  { %668 = vrot.lane.b32.xlu1 %v395_v47, %s1539_s12 }
 0x3d8   :  { %v508_v21 = vpop.xlane.xlu1 %507 }
 0x3d9   :  { %1158 = vrcp.f32 %v508_v21 }
 0x3dc   :  { %v511_v22 = vpop.xlane.xlu1 %510 }
 0x3dd   :  { %1160 = vrcp.f32 %v511_v22 }
 0x3e0   :  { %v617_v32 = vpop.permute.xlu1 %616 }
 0x3e3   :  { %v1159_v23 = vpop.eup %1158 }
 0x3e4   :  { %v514_v24 = vmul.f32 %v1159_v23, %v1155_v14  ;;  %v669_v33 = vpop.permute.xlu1 %668  ;;  %v857_v14 = vld [vmem:[#allocation17 + $0x8] sm:$0xff] }
 0x3e5   :  { %v861_v17 = vpack.c.bf16 %v857_v14, %v856_v13 }
 0x3e6   :  { %516 = vst.msk [vmem:[#allocation24] sm:$0xff] %vm493_vm4, %v514_v24  ;;  %v518_v26 = vpack.c.bf16 %v514_v24, %v514_v24 }
 0x3e7   :  { %v1161_v27 = vpop.eup %1160 }
 0x3e8   :  { %v515_v29 = vmul.f32 %v1161_v27, %v1157_v18  ;;  %1087 = vmatmul.mubr.msk.bf16.vlgmr.msra.gmra.mrb[8].mxu1 %vm493_vm4, %v518_v26  ;;  %v858_v18 = vld [vmem:[#allocation17 + $0x10] sm:$0xff] }
 0x3e9   :  { %1097 = vmatpush3.bf16.xpose.msra.mxu1 %v625_v28  ;;  %1098 = vmatprep.mubr.msk.bf16.mxu1 %vm1538_vm0, %v1537_v0  ;;  %v862_v20 = vpack.c.bf16 %v859_v19, %v858_v18 }
 0x3ea   :  { %517 = vst.msk [vmem:[#allocation24 + $0x10] sm:$0xff] %vm493_vm4, %v515_v29  ;;  %v519_v30 = vpack.c.bf16 %v515_v29, %v515_v29  ;;  %1108 = vmatprep.subr.bf16.mxu1 %v1537_v0 }
 0x3ec   :  { %1093 = vmatmul.mubr.msk.bf16.vlgmr.msra.gmra.mrb[12].mxu0 %vm493_vm4, %v519_v30 }
 0x3ed   :  { %1103 = vmatpush3.bf16.xpose.msra.mxu0 %v677_v31  ;;  %1104 = vmatprep.mubr.msk.bf16.mxu0 %vm1538_vm0, %v1537_v0 }
 0x3ee   :  { %1114 = vmatprep.subr.bf16.mxu0 %v1537_v0 }
 0x3f0   :  { %1099 = vmatmul.mubr.msk.bf16.vlgmr.msra.gmra.mrb[12].mxu1 %vm398_vm2, %v617_v32 }
 0x3f1   :  { %1110 = vmatprep.mubr.msk.bf16.mxu1 %vm1538_vm0, %v1537_v0 }
 0x3f4   :  { %1105 = vmatmul.mubr.msk.bf16.vlgmr.msra.gmra.mrb[16].mxu0 %vm398_vm2, %v669_v33 }
 0x3f5   :  { %1116 = vmatprep.mubr.msk.bf16.mxu0 %vm1538_vm0, %v1537_v0 }
 0x4bb   :  { %v1889_v34 = vpop.f32.mrb[8].mxu1 }
 0x4bc   :  { %v1088_v35 = vpop.f32.mrb[9].mxu1 }
 0x4bd   :  { %v566_v36 = vpop.f32.mrb[10].mxu1 }
 0x4be   :  { %v1089_v37 = vpop.f32.mrb[11].mxu1  ;;  %v1016_v36 = vld [vmem:[#allocation19] ss:$0 sm:$0xff] }
 0x4bf   :  { %v1891_v38 = vpop.f32.mrb[12].mxu0 }
 0x4c0   :  { %v1094_v39 = vpop.f32.mrb[13].mxu0 }
 0x4c1   :  { %v612_v40 = vpop.f32.mrb[14].mxu0 }
 0x4c2   :  { %v1095_v41 = vpop.f32.mrb[15].mxu0 }
 0x4c3   :  { %v661_v42 = vpop.f32.mrb[12].mxu1 }
 0x4c4   :  { %v719_v43 = vmul.f32 0.25, %v661_v42  ;;  %v1100_v44 = vpop.f32.mrb[13].mxu1 }
 0x4c5   :  { %v664_v45 = vpop.f32.mrb[14].mxu1 }
 0x4c6   :  { %v1101_v46 = vpop.f32.mrb[15].mxu1  ;;  %v721_v47 = vsel %vm493_vm4, %v719_v43, -inf }
 0x4c7   :  { %722 = vmax.xlane.f32.xlu0 %v721_v47  ;;  %v713_v48 = vpop.f32.mrb[16].mxu0 }
 0x4c8   :  { %v720_v49 = vmul.f32 0.25, %v713_v48  ;;  %v1106_v50 = vpop.f32.mrb[17].mxu0 }
 0x4c9   :  { %v716_v51 = vpop.f32.mrb[18].mxu0 }
 0x4ca   :  { %v1107_v52 = vpop.f32.mrb[19].mxu0  ;;  %v724_v54 = vsel %vm493_vm4, %v720_v49, -inf }
 0x4cb   :  { %725 = vmax.xlane.f32.xlu1 %v724_v54 }
 0x4dc   :  { %798 = vrot.lane.b32.xlu1 %v1858_v57, %s1539_s12 }
 0x554   :  { %v723_v55 = vpop.xlane.xlu0 %722 }
 0x555   :  { %v727_v56 = vsub.f32 %v719_v43, %v723_v55 }
 0x557   :  { %v729_v58 = vmul.f32 1.442695, %v727_v56 }
 0x558   :  { %v726_v59 = vpop.xlane.xlu1 %725 }
 0x559   :  { %1162 = vpow2.f32 %v729_v58  ;;  %v728_v60 = vsub.f32 %v720_v49, %v726_v59 }
 0x55b   :  { %v731_v61 = vmul.f32 1.442695, %v728_v60 }
 0x55c   :  { %v799_v62 = vpop.permute.xlu1 %798 }
 0x55d   :  { %1164 = vpow2.f32 %v731_v61  ;;  %v804_v63 = vsel %vm525_vm3, %v799_v62, 0 }
 0x55e   :  { %1115 = vmatpush3.bf16.msra.mxu0 %v804_v63 }
 0x563   :  { %v1163_v1 = vpop.eup %1162 }
 0x564   :  { %v733_v2 = vsel %vm493_vm4, %v1163_v1, 0.0 }
 0x565   :  { %734 = vadd.xlane.f32.xlu0 %v733_v2 }
 0x567   :  { %v1165_v3 = vpop.eup %1164 }
 0x568   :  { %v736_v4 = vsel %vm493_vm4, %v1165_v3, 0.0 }
 0x569   :  { %737 = vadd.xlane.f32.xlu0 %v736_v4 }
 0x57f   :  { %749 = vrot.lane.b32.xlu0 %v1854_v53, %s1539_s12 }
 0x5f2   :  { %v735_v57 = vpop.xlane.xlu0 %734 }
 0x5f3   :  { %1166 = vrcp.f32 %v735_v57 }
 0x5f6   :  { %v738_v5 = vpop.xlane.xlu0 %737 }
 0x5f7   :  { %1168 = vrcp.f32 %v738_v5 }
 0x5fa   :  { %v750_v6 = vpop.permute.xlu0 %749 }
 0x5fb   :  { %v755_v7 = vsel %vm525_vm3, %v750_v6, 0 }
 0x5fc   :  { %1109 = vmatpush3.bf16.msra.mxu1 %v755_v7 }
 0x5fd   :  { %v1167_v8 = vpop.eup %1166  ;;  %1120 = vmatprep.subr.bf16.mxu1 %v1537_v0 }
 0x5fe   :  { %v741_v9 = vmul.f32 %v1167_v8, %v1163_v1 }
 0x600   :  { %744 = vst.msk [vmem:[#allocation24 + $0x8] sm:$0xff] %vm493_vm4, %v741_v9  ;;  %v746_v10 = vpack.c.bf16 %v741_v9, %v741_v9 }
 0x601   :  { %v1169_v11 = vpop.eup %1168 }
 0x602   :  { %v742_v12 = vmul.f32 %v1169_v11, %v1165_v3  ;;  %1111 = vmatmul.mubr.msk.bf16.vlgmr.msra.gmra.mrb[16].mxu1 %vm493_vm4, %v746_v10 }
 0x603   :  { %1124 = vmatprep.mubr.msk.bf16.mxu1 %vm1538_vm0, %v1537_v0  ;;  %1121 = vmatpush3.bf16.msra.mxu1 %v861_v17 }
 0x604   :  { %745 = vst.msk [vmem:[#allocation24 + $0x18] sm:$0xff] %vm493_vm4, %v742_v12  ;;  %v747_v53 = vpack.c.bf16 %v742_v12, %v742_v12  ;;  %1122 = vmatprep.subr.bf16.mxu1 %v1537_v0 }
 0x606   :  { %1117 = vmatmul.mubr.msk.bf16.vlgmr.msra.gmra.mrb[20].mxu0 %vm493_vm4, %v747_v53 }
 0x607   :  { %1123 = vmatpush3.bf16.msra.mxu1 %v862_v20 }
 0x6d5   :  { %v791_v21 = vpop.f32.mrb[16].mxu1 }
 0x6d6   :  { %v1112_v22 = vpop.f32.mrb[17].mxu1 }
 0x6d7   :  { %v794_v23 = vpop.f32.mrb[18].mxu1 }
 0x6d8   :  { %v1113_v24 = vpop.f32.mrb[19].mxu1 }
 0x6d9   :  { %v840_v25 = vpop.f32.mrb[20].mxu0 }
 0x6da   :  { %v1149_v26 = vpack.i.bf16 %v840_v25, %v791_v21  ;;  %v1118_v27 = vpop.f32.mrb[21].mxu0 }
 0x6db   :  { %v843_v28 = vpop.f32.mrb[22].mxu0 }
 0x6dc   :  { %1150 = vrot.lane.b32.xlu1 %v1149_v26, %s1540_s1  ;;  %v1119_v29 = vpop.f32.mrb[23].mxu0 }
 0x74e   :  { %v1151_v30 = vpop.permute.xlu1 %1150 }
 0x74f   :  { %v1153_v31 = vunpack.i.h.bf16 %v1151_v30  ;;  %v1152_v32 = vunpack.i.l.bf16 %v1151_v30 }
 0x751   :  { %v855_v0 = vsel %vm398_vm2, %v1891_v38, %v1153_v31  ;;  %v854_v33 = vsel %vm398_vm2, %v1889_v34, %v1152_v32 }
 0x752   :  { %v860_v35 = vpack.c.bf16 %v855_v0, %v854_v33 }
 0x754   :  { %1125 = vmatmul.mubr.msk.bf16.vlgmr.msra.gmra.mrb[20].mxu1 %vm229_vm1, %v860_v35 }
 0x827   :  { %v907_v37 = vpop.f32.mrb[20].mxu1 }
 0x828   :  { %v908_v39 = vadd.f32 %v1016_v36, %v907_v37  ;;  %v1126_v40 = vpop.f32.mrb[21].mxu1 }
 0x829   :  { %v910_v41 = vpop.f32.mrb[22].mxu1 }
 0x82a   :  { %v911_v42 = vadd.f32 %v1016_v36, %v910_v41  ;;  %v1127_v43 = vpop.f32.mrb[23].mxu1  ;;  %v914_v44 = vadd.f32 %v908_v39, %v1823_v15 }
 0x82c   :  { %v918_v45 = vsel %vm229_vm1, %v914_v44, 0.0  ;;  %v915_v46 = vadd.f32 %v911_v42, %v1825_v16 }
 0x82d   :  { %919 = vadd.xlane.f32.xlu1 %v918_v45 }
 0x82e   :  { %v921_v38 = vsel %vm229_vm1, %v915_v46, 0.0 }
 0x82f   :  { %922 = vadd.xlane.f32.xlu0 %v921_v38 }
 0x8ba   :  { %v920_v34 = vpop.xlane.xlu1 %919 }
 0x8bb   :  { %v925_v47 = vmul.f32 0.03125, %v920_v34 }
 0x8bc   :  { %v923_v48 = vpop.xlane.xlu0 %922 }
 0x8bd   :  { %v927_v49 = vsub.f32 %v914_v44, %v925_v47  ;;  %v926_v50 = vmul.f32 0.03125, %v923_v48 }
 0x8bf   :  { %v928_v51 = vsub.f32 %v915_v46, %v926_v50  ;;  %v929_v52 = vmul.f32 %v927_v49, %v927_v49 }
 0x8c1   :  { %v931_v54 = vsel %vm229_vm1, %v929_v52, 0.0  ;;  %v930_v55 = vmul.f32 %v928_v51, %v928_v51 }
 0x8c2   :  { %932 = vadd.xlane.f32.xlu0 %v931_v54 }
 0x8c3   :  { %v934_v15 = vsel %vm229_vm1, %v930_v55, 0.0 }
 0x8c6   :  { %935 = vadd.xlane.f32.xlu0 %v934_v15 }
 0x8c7   :  { %1471 = shalt.err (!%p1468_p10)
}
 0x8c8   :  { %s1472_s23 = scalar_lea.hbm %s1968_s14, 512 }
 0x8c9   :  { %p1473_p11 = scmp.ne.s32.totalorder %s1968_s14, %s1472_s23  ;;  %p1476_p12 = scmp.lt.u32.totalorder %s1472_s23, %s1968_s14 }
 0x8cb   :  { %p1478_p13 = pnand %p1476_p12, %p1473_p11 }
 0x8cd   :  { %1481 = shalt.err (!%p1478_p13)
}
 0x8ce   :  { %986 = dma.vmem_to_hbm [thread:$0]  %s981_s20, 512, %s1968_s14, [#allocation25], %s1524_s25, %s1524_s25, %s1525_s26   ;;  %v1018_v63 = vld [vmem:[#allocation20] ss:$0 sm:$0xff]  ;;  %v1019_v2 = vld [vmem:[#allocation22] ss:$0 sm:$0xff] }
 0x8cf   :  { %s1542_s5 = smov [#allocation23]  }
 0x8d0   :  { %s968_s24 = sshll.u32 %s1542_s5, 4  ;;  %s969_s24 = int_to_ptr.vmem [resolvable:$true] %s968_s24 }
 0x8d1   :  { %s1482_s14 = scalar_lea.vmem %s969_s24, 256  ;;  %p1487_p1 = scmp.lt.s32.totalorder %s969_s24, %s969_s24 }
 0x8d2   :  { %p1483_p0 = scmp.ne.s32.totalorder %s969_s24, %s1482_s14  ;;  %p1488_p2 = scmp.lt.s32.totalorder %s1482_s14, %s1482_s14 }
 0x8d4   :  { %p1489_p3 = por %p1488_p2, %p1487_p1 }
 0x8d6   :  { %p1490_p4 = pnand %p1489_p3, %p1483_p0 }
 0x94f   :  { %v933_v16 = vpop.xlane.xlu0 %932 }
 0x950   :  { %v937_v56 = vmul.f32 0.03125, %v933_v16 }
 0x952   :  { %v939_v58 = vadd.f32 1e-05, %v937_v56 }
 0x953   :  { %v936_v59 = vpop.xlane.xlu0 %935 }
 0x954   :  { %1170 = vrsqrt.f32 %v939_v58  ;;  %v938_v60 = vmul.f32 0.03125, %v936_v59 }
 0x956   :  { %v940_v61 = vadd.f32 1e-05, %v938_v60 }
 0x958   :  { %1172 = vrsqrt.f32 %v940_v61 }
 0x95e   :  { %v1171_v62 = vpop.eup %1170 }
 0x95f   :  { %v943_v1 = vmul.f32 %v1171_v62, %v927_v49 }
 0x961   :  { %v951_v3 = vmul.f32 %v1018_v63, %v943_v1 }
 0x962   :  { %v1173_v4 = vpop.eup %1172 }
 0x963   :  { %v944_v57 = vmul.f32 %v1173_v4, %v928_v51  ;;  %v959_v5 = vadd.f32 %v1019_v2, %v951_v3 }
 0x965   :  { %v952_v6 = vmul.f32 %v1018_v63, %v944_v57  ;;  %961 = vst.msk [vmem:[#allocation23] sm:$0xff] %vm229_vm1, %v959_v5 }
 0x967   :  { %v960_v7 = vadd.f32 %v1019_v2, %v952_v6 }
 0x969   :  { %962 = vst.msk [vmem:[#allocation23 + $0x8] sm:$0xff] %vm229_vm1, %v960_v7 }
 0x96a   :  { %1493 = shalt.err (!%p1490_p4)
}
 0x96b   :  { %s1494_s21 = scalar_lea.hbm %s1967_s13, 256 }
 0x96c   :  { %p1495_p5 = scmp.ne.s32.totalorder %s1967_s13, %s1494_s21  ;;  %p1498_p6 = scmp.lt.u32.totalorder %s1494_s21, %s1967_s13 }
 0x96e   :  { %p1500_p7 = pnand %p1498_p6, %p1495_p5 }
 0x970   :  { %1503 = shalt.err (!%p1500_p7)
}
 0x971   :  { %974 = dma.vmem_to_hbm [thread:$0]  %s969_s24, 256, %s1967_s13, [#allocation4], %s1524_s25, %s1524_s25, %s1525_s26  }
 0x972   :  { %1518 = dma.done.wait [#allocation4], 256  }
 0x973   :  { %1519 = vsyncadd [#allocation4], 4294967040 }
 0x974   :  { %1520 = dma.done.wait [#allocation25], 512  }
 0x975   :  { %1521 = vsyncadd [#allocation25], 4294966784 }
 0x976   :  { %993 = vsyncpa [#allocation3], 1 }
 0x977   :  { %994 = vsyncpa [#allocation6], 1 }
 0x978   :  { %995 = vsyncpa [#allocation9], 1 }
 0x979   :  { %996 = vsyncpa [#allocation12], 1 }
 0x97a   :  { %997 = vsyncpa [#allocation15], 1 }
 0x97b   :  { %998 = vsyncpa [#allocation18], 1 }
 0x97c   :  { %999 = vsyncpa [#allocation21], 1 }
 0x97d   :  { %1000 = vsyncpa [#allocation4], 1 }
 0x97e   :  { %1001 = vsyncpa [#allocation25], 1 }

</bundles_post_ra>
